<compile_context>
chip_gen: v5e
topology: v5e:2x2
jax: 0.10.0
libtpu: 0.0.40
codegen_flags: <defaults>
</compile_context>

<pallas_src>
import functools

import jax
import jax.numpy as jnp
from jax import lax
from jax.experimental import pallas as pl
from jax.experimental.pallas import tpu as pltpu

LN_EPS = 1e-5  # torch.nn.LayerNorm default


def _round_up(n, m):
    return ((n + m - 1) // m) * m


def _cdiv(a, b):
    return (a + b - 1) // b


def _vmem_cap_bytes():
    """~80% of this chip's per-core VMEM; conservative fallback if the query fails."""
    try:
        info = pltpu.get_tpu_info()
        cap = getattr(info, "vmem_capacity_bytes", None)
        if cap:
            return int(0.8 * cap)
    except Exception:
        pass
    return 48 * 1024 * 1024  # safe on every generation (v7x has 64 MiB physical VMEM)


def _choose_row_tile(B, tm):
    """Row tile: multiple of 8, <= tm, preferring an even (>= 2) tile count so the
    'parallel' row axis splits evenly over v7x's two TensorCores."""
    tm_eff = max(8, min((tm // 8) * 8, _round_up(B, 8)))
    n = _cdiv(B, tm_eff)
    if n < 2 or n % 2:
        target = max(2, _round_up(n, 2))
        tm_eff = max(8, _round_up(_cdiv(B, target), 8))
        n = _cdiv(B, tm_eff)  # best effort; tiny batches may still yield a single tile
    return tm_eff, n


def _ln_relu_epilogue(z, gamma, beta):
    """LayerNorm (biased variance, one-pass moments) + affine + ReLU, all in f32."""
    mean = jnp.mean(z, axis=-1, keepdims=True)         # XLU lane reduction
    mean_sq = jnp.mean(z * z, axis=-1, keepdims=True)  # issued back-to-back with the first
    var = jnp.maximum(mean_sq - mean * mean, 0.0)      # guard tiny f32 cancellation
    zn = (z - mean) * lax.rsqrt(var + LN_EPS)          # EUP rsqrt
    return jnp.maximum(zn * gamma + beta, 0.0)


def resblock_kernel(x_ref, w1_ref, b1_ref, w2_ref, b2_ref, g_ref, beta_ref, o_ref):
    """Fully-resident-weights path: one row tile per grid step."""
    x = x_ref[...]
    mm_dtype = w1_ref.dtype  # bf16 fast path

    # net(x) = Linear2(ReLU(Linear1(x))) -- bf16 x bf16 -> f32 accumulation on the MXU.
    h = jnp.dot(x.astype(mm_dtype), w1_ref[...], preferred_element_type=jnp.float32)
    h = jnp.maximum(h + b1_ref[...], 0.0)          # (1, H) bias row-broadcast, f32
    y = jnp.dot(h.astype(mm_dtype), w2_ref[...], preferred_element_type=jnp.float32)
    y = y + b2_ref[...]                            # (1, D) bias broadcast, f32

    z = x.astype(jnp.float32) + y                  # residual add
    o_ref[...] = _ln_relu_epilogue(z, g_ref[...], beta_ref[...]).astype(o_ref.dtype)


def resblock_chunked_kernel(x_ref, w1_ref, b1_ref, w2_ref, b2_ref, g_ref, beta_ref,
                            o_ref, acc_ref):
    """Hidden-chunked streaming path: grid=(row tiles, hidden chunks)."""
    c = pl.program_id(1)

    @pl.when(c == 0)
    def _():
        acc_ref[...] = jnp.zeros_like(acc_ref)

    x = x_ref[...]
    mm_dtype = w1_ref.dtype
    h = jnp.dot(x.astype(mm_dtype), w1_ref[...], preferred_element_type=jnp.float32)
    h = jnp.maximum(h + b1_ref[...], 0.0)
    acc_ref[...] += jnp.dot(h.astype(mm_dtype), w2_ref[...],
                            preferred_element_type=jnp.float32)

    @pl.when(c == pl.num_programs(1) - 1)
    def _():
        y = acc_ref[...] + b2_ref[...]
        z = x.astype(jnp.float32) + y
        o_ref[...] = _ln_relu_epilogue(z, g_ref[...], beta_ref[...]).astype(o_ref.dtype)


@functools.partial(jax.jit,
                   static_argnames=("tm", "th", "matmul_dtype", "force_chunked"))
def resblock_forward(x, w1, b1, w2, b2, gamma, beta, *,
                     tm=512, th=None, matmul_dtype=jnp.bfloat16, force_chunked=False):
    """x: (B, dim); w1: (dim, hidden); w2: (hidden, dim); biases / LN affine as (1, ...)."""
    B, D = x.shape
    H = w1.shape[1]

    tm_eff, n_row_tiles = _choose_row_tile(B, tm)

    # Weights on the bf16 MXU path; biases / LN params stay f32 for the epilogue.
    w1c = w1.astype(matmul_dtype)
    w2c = w2.astype(matmul_dtype)

    x_bytes = x.dtype.itemsize
    w_bytes = jnp.dtype(matmul_dtype).itemsize
    cap = _vmem_cap_bytes()

    # Footprint: single-buffered constants + double-buffered x/out tiles + f32 intermediates.
    param_bytes = 2 * D * H * w_bytes + (H + 3 * D) * 4
    act_bytes = 2 * 2 * tm_eff * D * x_bytes
    tmp_bytes = 4 * tm_eff * (H + 2 * D)

    use_chunked = force_chunked or (param_bytes + act_bytes + tmp_bytes > int(0.75 * cap))

    cost = pl.CostEstimate(
        flops=4 * B * D * H + 10 * B * D,
        transcendentals=B,  # one rsqrt per row
        bytes_accessed=2 * B * D * x_bytes + 2 * D * H * w_bytes + (H + 3 * D) * 4,
    )

    const1 = pl.Buffered(1)  # constant-index blocks are DMA'd once -> single buffer

    if not use_chunked:
        est = param_bytes + act_bytes + tmp_bytes
        vmem_limit = int(min(max(int(1.5 * est), 32 * 1024 * 1024), cap))
        return pl.pallas_call(
            resblock_kernel,
            out_shape=jax.ShapeDtypeStruct((B, D), x.dtype),
            grid_spec=pltpu.PrefetchScalarGridSpec(
                num_scalar_prefetch=0,
                grid=(n_row_tiles,),  # ragged last tile: undefined reads, masked stores
                in_specs=[
                    pl.BlockSpec((tm_eff, D), lambda i: (i, 0)),                   # x tile
                    pl.BlockSpec((D, H), lambda i: (0, 0), pipeline_mode=const1),  # W1 resident
                    pl.BlockSpec((1, H), lambda i: (0, 0), pipeline_mode=const1),  # b1
                    pl.BlockSpec((H, D), lambda i: (0, 0), pipeline_mode=const1),  # W2 resident
                    pl.BlockSpec((1, D), lambda i: (0, 0), pipeline_mode=const1),  # b2
                    pl.BlockSpec((1, D), lambda i: (0, 0), pipeline_mode=const1),  # LN gamma
                    pl.BlockSpec((1, D), lambda i: (0, 0), pipeline_mode=const1),  # LN beta
                ],
                out_specs=pl.BlockSpec((tm_eff, D), lambda i: (i, 0)),
            ),
            compiler_params=pltpu.CompilerParams(
                dimension_semantics=("parallel",),
                vmem_limit_bytes=vmem_limit,
            ),
            cost_estimate=cost,
        )(x, w1c, b1, w2c, b2, gamma, beta)

    # ---- Hidden-chunked weight-streaming path (large D*H, e.g. v7x's 64 MiB VMEM). ----
    if th is None:
        th = 128
        for cand in (2048, 1024, 512, 256, 128):
            if H % cand == 0 and 8 * D * cand * w_bytes <= cap // 2:
                th = cand
                break
    assert H % th == 0 and th % 128 == 0, "hidden chunk must be a 128-multiple dividing H"
    n_chunks = H // th

    est = (act_bytes                      # x / out tiles (double-buffered)
           + 2 * 2 * D * th * w_bytes     # W1 / W2 chunks (double-buffered)
           + 2 * 2 * th * 4 + 3 * D * 4   # b1 chunks + b2 / gamma / beta
           + 4 * tm_eff * (th + 2 * D)    # f32 h / z / out intermediates
           + 4 * tm_eff * D)              # f32 y-accumulator scratch
    vmem_limit = int(min(max(int(1.5 * est), 32 * 1024 * 1024), cap))

    return pl.pallas_call(
        resblock_chunked_kernel,
        out_shape=jax.ShapeDtypeStruct((B, D), x.dtype),
        grid_spec=pltpu.PrefetchScalarGridSpec(
            num_scalar_prefetch=0,
            grid=(n_row_tiles, n_chunks),
            in_specs=[
                pl.BlockSpec((tm_eff, D), lambda i, c: (i, 0)),                   # x (reused over c)
                pl.BlockSpec((D, th), lambda i, c: (0, c)),                       # W1 chunk
                pl.BlockSpec((1, th), lambda i, c: (0, c)),                       # b1 chunk
                pl.BlockSpec((th, D), lambda i, c: (c, 0)),                       # W2 chunk
                pl.BlockSpec((1, D), lambda i, c: (0, 0), pipeline_mode=const1),  # b2
                pl.BlockSpec((1, D), lambda i, c: (0, 0), pipeline_mode=const1),  # LN gamma
                pl.BlockSpec((1, D), lambda i, c: (0, 0), pipeline_mode=const1),  # LN beta
            ],
            out_specs=pl.BlockSpec((tm_eff, D), lambda i, c: (i, 0)),
            scratch_shapes=[pltpu.VMEM((tm_eff, D), jnp.float32)],
        ),
        compiler_params=pltpu.CompilerParams(
            dimension_semantics=("parallel", "arbitrary"),
            vmem_limit_bytes=vmem_limit,
        ),
        cost_estimate=cost,
    )(x, w1c, b1, w2c, b2, gamma, beta)


def init_params(key, dim, resblock_dim):
    """Deterministic synthetic params mimicking the PyTorch module's shapes (pre-transposed)."""
    k1, k2, k3, k4 = jax.random.split(key, 4)
    lim1 = 1.0 / jnp.sqrt(dim)
    w1_t = jax.random.uniform(k1, (dim, resblock_dim), jnp.float32, -lim1, lim1)
    b1 = jax.random.uniform(k2, (1, resblock_dim), jnp.float32, -lim1, lim1)
    lim2 = 1.0 / jnp.sqrt(resblock_dim)
    w2_t = jax.random.uniform(k3, (resblock_dim, dim), jnp.float32, -lim2, lim2)
    b2 = jax.random.uniform(k4, (1, dim), jnp.float32, -lim2, lim2)
    gamma = jnp.ones((1, dim), jnp.float32)   # PyTorch LayerNorm default init
    beta = jnp.zeros((1, dim), jnp.float32)
    return w1_t, b1, w2_t, b2, gamma, beta


def resblock_reference(x, w1, b1, w2, b2, gamma, beta, matmul_dtype=jnp.bfloat16):
    """Pure-JAX reference with the same (bf16 matmul, f32 LN) precision recipe."""
    h = jnp.dot(x.astype(matmul_dtype), w1.astype(matmul_dtype),
                preferred_element_type=jnp.float32) + b1
    h = jnp.maximum(h, 0.0)
    y = jnp.dot(h.astype(matmul_dtype), w2.astype(matmul_dtype),
                preferred_element_type=jnp.float32) + b2
    z = x + y
    mean = jnp.mean(z, axis=-1, keepdims=True)
    var = jnp.mean((z - mean) ** 2, axis=-1, keepdims=True)
    zn = (z - mean) * lax.rsqrt(var + LN_EPS)
    return jnp.maximum(zn * gamma + beta, 0.0)


if __name__ == "__main__":
    # Lane-dense feature dims (multiples of 128; prefer 256-multiples on v6e/v7x); batch is
    # deliberately not a multiple of the row tile to exercise the ragged-last-tile path.
    batch, dim, hidden = 500, 128, 256

    key = jax.random.PRNGKey(0)
    kx, kp = jax.random.split(key)
    x = jax.random.normal(kx, (batch, dim), jnp.float32)
    params = init_params(kp, dim, hidden)

    ref = resblock_reference(x, *params, matmul_dtype=jnp.bfloat16)

    # Resident-weights fast path (default: tm=512 -> two 256-row tiles here, even for megacore).
    out = jax.block_until_ready(resblock_forward(x, *params))
    assert out.shape == (batch, dim)
    assert jnp.allclose(out, ref, atol=2e-3, rtol=2e-3), "resident path mismatch vs reference"

    # Hidden-chunked streaming path (forced here; auto-selected when D*H outgrows the VMEM cap).
    out_c = jax.block_until_ready(resblock_forward(x, *params, force_chunked=True, th=128))
    assert jnp.allclose(out_c, ref, atol=2e-3, rtol=2e-3), "chunked path mismatch vs reference"

    print("KERNEL_OK")
</pallas_src>

<mosaic_0001>
module attributes {stable_mosaic.version = 11 : i64} {
  func.func @resblock_kernel(%arg0: i32, %arg1: memref<256x128xf32, #tpu.memory_space<vmem>>, %arg2: memref<128x256xbf16, #tpu.memory_space<vmem>>, %arg3: memref<1x256xf32, #tpu.memory_space<vmem>>, %arg4: memref<256x128xbf16, #tpu.memory_space<vmem>>, %arg5: memref<1x128xf32, #tpu.memory_space<vmem>>, %arg6: memref<1x128xf32, #tpu.memory_space<vmem>>, %arg7: memref<1x128xf32, #tpu.memory_space<vmem>>, %arg8: memref<256x128xf32, #tpu.memory_space<vmem>>) attributes {dimension_semantics = [#tpu.dimension_semantics<parallel>], iteration_bounds = array<i64: 2>, scalar_prefetch = 0 : i64, scratch_operands = 0 : i64, tpu.core_type = #tpu.core_type<tc>, window_params = [{transform_indices = @transform_0, window_bounds = array<i64: 256, 128>}, {pipeline_mode = #tpu.pipeline_mode<synchronous>, transform_indices = @transform_1, window_bounds = array<i64: 128, 256>}, {pipeline_mode = #tpu.pipeline_mode<synchronous>, transform_indices = @transform_2, window_bounds = array<i64: 1, 256>}, {pipeline_mode = #tpu.pipeline_mode<synchronous>, transform_indices = @transform_3, window_bounds = array<i64: 256, 128>}, {pipeline_mode = #tpu.pipeline_mode<synchronous>, transform_indices = @transform_4, window_bounds = array<i64: 1, 128>}, {pipeline_mode = #tpu.pipeline_mode<synchronous>, transform_indices = @transform_5, window_bounds = array<i64: 1, 128>}, {pipeline_mode = #tpu.pipeline_mode<synchronous>, transform_indices = @transform_6, window_bounds = array<i64: 1, 128>}, {transform_indices = @transform_7, window_bounds = array<i64: 256, 128>}]} {
    %c0 = arith.constant 0 : index
    %c0_0 = arith.constant 0 : index
    %0 = vector.load %arg1[%c0, %c0_0] : memref<256x128xf32, #tpu.memory_space<vmem>>, vector<256x128xf32>
    %1 = arith.truncf %0 : vector<256x128xf32> to vector<256x128xbf16>
    %c0_1 = arith.constant 0 : index
    %c0_2 = arith.constant 0 : index
    %2 = vector.load %arg2[%c0_1, %c0_2] : memref<128x256xbf16, #tpu.memory_space<vmem>>, vector<128x256xbf16>
    %cst = arith.constant dense<0.000000e+00> : vector<256x256xf32>
    %3 = tpu.matmul %1, %2, %cst {dimension_numbers = #tpu.dot_dimension_numbers<[1], [0], [0], [1], [0, 0, 1, 1], [], []>} : vector<256x128xbf16>, vector<128x256xbf16>, vector<256x256xf32> -> vector<256x256xf32>
    %c0_3 = arith.constant 0 : index
    %c0_4 = arith.constant 0 : index
    %4 = vector.load %arg3[%c0_3, %c0_4] : memref<1x256xf32, #tpu.memory_space<vmem>>, vector<1x256xf32>
    %5 = vector.broadcast %4 : vector<1x256xf32> to vector<256x256xf32>
    %6 = arith.addf %3, %5 : vector<256x256xf32>
    %cst_5 = arith.constant 0.000000e+00 : f32
    %7 = vector.broadcast %cst_5 : f32 to vector<256x256xf32>
    %8 = arith.maximumf %6, %7 : vector<256x256xf32>
    %9 = arith.truncf %8 : vector<256x256xf32> to vector<256x256xbf16>
    %c0_6 = arith.constant 0 : index
    %c0_7 = arith.constant 0 : index
    %10 = vector.load %arg4[%c0_6, %c0_7] : memref<256x128xbf16, #tpu.memory_space<vmem>>, vector<256x128xbf16>
    %cst_8 = arith.constant dense<0.000000e+00> : vector<256x128xf32>
    %11 = tpu.matmul %9, %10, %cst_8 {dimension_numbers = #tpu.dot_dimension_numbers<[1], [0], [0], [1], [0, 0, 1, 1], [], []>} : vector<256x256xbf16>, vector<256x128xbf16>, vector<256x128xf32> -> vector<256x128xf32>
    %c0_9 = arith.constant 0 : index
    %c0_10 = arith.constant 0 : index
    %12 = vector.load %arg5[%c0_9, %c0_10] : memref<1x128xf32, #tpu.memory_space<vmem>>, vector<1x128xf32>
    %13 = vector.broadcast %12 : vector<1x128xf32> to vector<256x128xf32>
    %14 = arith.addf %11, %13 : vector<256x128xf32>
    %15 = arith.addf %0, %14 : vector<256x128xf32>
    %c0_11 = arith.constant 0 : index
    %c0_12 = arith.constant 0 : index
    %16 = vector.load %arg6[%c0_11, %c0_12] : memref<1x128xf32, #tpu.memory_space<vmem>>, vector<1x128xf32>
    %c0_13 = arith.constant 0 : index
    %c0_14 = arith.constant 0 : index
    %17 = vector.load %arg7[%c0_13, %c0_14] : memref<1x128xf32, #tpu.memory_space<vmem>>, vector<1x128xf32>
    %cst_15 = arith.constant dense<0.000000e+00> : vector<256xf32>
    %18 = vector.multi_reduction <add>, %15, %cst_15 [1] : vector<256x128xf32> to vector<256xf32>
    %19 = vector.shape_cast %18 : vector<256xf32> to vector<256x1xf32>
    %cst_16 = arith.constant 1.280000e+02 : f32
    %20 = vector.broadcast %cst_16 : f32 to vector<256x1xf32>
    %21 = arith.divf %19, %20 : vector<256x1xf32>
    %22 = arith.mulf %15, %15 : vector<256x128xf32>
    %cst_17 = arith.constant dense<0.000000e+00> : vector<256xf32>
    %23 = vector.multi_reduction <add>, %22, %cst_17 [1] : vector<256x128xf32> to vector<256xf32>
    %24 = vector.shape_cast %23 : vector<256xf32> to vector<256x1xf32>
    %cst_18 = arith.constant 1.280000e+02 : f32
    %25 = vector.broadcast %cst_18 : f32 to vector<256x1xf32>
    %26 = arith.divf %24, %25 : vector<256x1xf32>
    %27 = arith.mulf %21, %21 : vector<256x1xf32>
    %28 = arith.subf %26, %27 : vector<256x1xf32>
    %cst_19 = arith.constant 0.000000e+00 : f32
    %29 = vector.broadcast %cst_19 : f32 to vector<256x1xf32>
    %30 = arith.maximumf %28, %29 : vector<256x1xf32>
    %31 = vector.broadcast %21 : vector<256x1xf32> to vector<256x128xf32>
    %32 = arith.subf %15, %31 : vector<256x128xf32>
    %cst_20 = arith.constant 9.99999974E-6 : f32
    %33 = vector.broadcast %cst_20 : f32 to vector<256x1xf32>
    %34 = arith.addf %30, %33 : vector<256x1xf32>
    %35 = math.rsqrt %34 : vector<256x1xf32>
    %36 = vector.broadcast %35 : vector<256x1xf32> to vector<256x128xf32>
    %37 = arith.mulf %32, %36 : vector<256x128xf32>
    %38 = vector.broadcast %16 : vector<1x128xf32> to vector<256x128xf32>
    %39 = arith.mulf %37, %38 : vector<256x128xf32>
    %40 = vector.broadcast %17 : vector<1x128xf32> to vector<256x128xf32>
    %41 = arith.addf %39, %40 : vector<256x128xf32>
    %cst_21 = arith.constant 0.000000e+00 : f32
    %42 = vector.broadcast %cst_21 : f32 to vector<256x128xf32>
    %43 = arith.maximumf %41, %42 : vector<256x128xf32>
    %c0_22 = arith.constant 0 : index
    %c0_23 = arith.constant 0 : index
    %44 = vector.load %arg8[%c0_22, %c0_23] : memref<256x128xf32, #tpu.memory_space<vmem>>, vector<256x128xf32>
    tpu.vector_store %arg8[%c0_22, %c0_23], %43 {strides = array<i32>} : memref<256x128xf32, #tpu.memory_space<vmem>>, vector<256x128xf32>,
    return
  }
  func.func @transform_0(%arg0: i32) -> (i32, i32) {
    %c0_i32 = arith.constant 0 : i32
    %c0_i32_0 = arith.constant 0 : i32
    return %arg0, %c0_i32 : i32, i32
  }
  func.func @transform_1(%arg0: i32) -> (i32, i32) {
    %c0_i32 = arith.constant 0 : i32
    %c0_i32_0 = arith.constant 0 : i32
    %c0_i32_1 = arith.constant 0 : i32
    return %c0_i32, %c0_i32_0 : i32, i32
  }
  func.func @transform_2(%arg0: i32) -> (i32, i32) {
    %c0_i32 = arith.constant 0 : i32
    %c0_i32_0 = arith.constant 0 : i32
    %c0_i32_1 = arith.constant 0 : i32
    return %c0_i32, %c0_i32_0 : i32, i32
  }
  func.func @transform_3(%arg0: i32) -> (i32, i32) {
    %c0_i32 = arith.constant 0 : i32
    %c0_i32_0 = arith.constant 0 : i32
    %c0_i32_1 = arith.constant 0 : i32
    return %c0_i32, %c0_i32_0 : i32, i32
  }
  func.func @transform_4(%arg0: i32) -> (i32, i32) {
    %c0_i32 = arith.constant 0 : i32
    %c0_i32_0 = arith.constant 0 : i32
    %c0_i32_1 = arith.constant 0 : i32
    return %c0_i32, %c0_i32_0 : i32, i32
  }
  func.func @transform_5(%arg0: i32) -> (i32, i32) {
    %c0_i32 = arith.constant 0 : i32
    %c0_i32_0 = arith.constant 0 : i32
    %c0_i32_1 = arith.constant 0 : i32
    return %c0_i32, %c0_i32_0 : i32, i32
  }
  func.func @transform_6(%arg0: i32) -> (i32, i32) {
    %c0_i32 = arith.constant 0 : i32
    %c0_i32_0 = arith.constant 0 : i32
    %c0_i32_1 = arith.constant 0 : i32
    return %c0_i32, %c0_i32_0 : i32, i32
  }
  func.func @transform_7(%arg0: i32) -> (i32, i32) {
    %c0_i32 = arith.constant 0 : i32
    %c0_i32_0 = arith.constant 0 : i32
    return %arg0, %c0_i32 : i32, i32
  }
}

</mosaic_0001>

<bundles_post_ra>
// kernel: resblock_forward.1
= control target key start
LH: loop header
LB: loop body
LE: loop exit
PB: predicated region body
PF: predicated region fallthrough
CT: control target
= control target key end

     0   :  { %12 = vsyncpa [#allocation3], 0  ;;  %s3577_s0 = inlined_call_operand.vmem [shape: f32[500,128], index: 0, kind: input, shape index: {}]   ;;  %s3578_s1 = inlined_call_operand.vmem [shape: bf16[128,256], index: 1, kind: input, shape index: {}]   ;;  %s3579_s2 = inlined_call_operand.vmem [shape: f32[1,256], index: 2, kind: input, shape index: {}]   ;;  %s3580_s3 = inlined_call_operand.vmem [shape: bf16[256,128], index: 3, kind: input, shape index: {}]   ;;  %s3581_s4 = inlined_call_operand.vmem [shape: f32[1,128], index: 4, kind: input, shape index: {}]   ;;  %s3582_s5 = inlined_call_operand.vmem [shape: f32[1,128], index: 5, kind: input, shape index: {}]   ;;  %s3583_s6 = inlined_call_operand.vmem [shape: f32[1,128], index: 6, kind: input, shape index: {}]   ;;  %s3584_s7 = inlined_call_operand.hbm [shape: f32[500,128], index: 7, kind: output, shape index: {}]  }
   0x1   :  { %14 = vsyncpa [#allocation3 + $0x1], 0  ;;  %s2455_s24 = smov 0   ;;  %s2457_s25 = smov 0  }
   0x2   :  { %s2459_s26 = smov 0   ;;  %s2461_s27 = smov 0  }
   0x3 LB: > { %s2476_s28 = sadd.s32 4294967295, %s2409_s27   ;;  %s2034_s29 = sadd.s32 4294967294, %s2409_s27   ;;  %s2409_s27 = sphi %s2461_s27, %s3593_s27   ;;  %s2405_s26 = sphi %s2459_s26, %s3592_s26   ;;  %s2401_s25 = sphi %s2457_s25, %s3591_s25   ;;  %s2397_s24 = sphi %s2455_s24, %s3590_s24  }
   0x4   : > { %s2480_s30 = sadd.s32 1, %s2409_s27   ;;  %s179_s8 = sadd.s32 1, %s2405_s26 }
   0x5   : > { %s176_s9 = ssub.s32 %s2409_s27, %s2480_s30  ;;  %p189_p0 = scmp.ne.s32.totalorder %s2405_s26, %s2401_s25 }
   0x6   : > { %p177_p1 = scmp.eq.s32.totalorder %s176_s9, 0  ;;  %p190_p2 = scmp.eq.s32.totalorder %s2476_s28, 1 }
   0x7   : > { %p195_p3 = scmp.ne.s32.totalorder %s2401_s25, %s2397_s24  ;;  %p196_p4 = scmp.eq.s32.totalorder %s2034_s29, 1 }
   0x8   : > { %s2491_s10 = scalar_select %p177_p1, %s2405_s26, %s179_s8  }
   0x9   : > { %p2493_p5 = por %p190_p2, %p189_p0  ;;  %p2497_p6 = por %p196_p4, %p195_p3 }
   0xa   : > { %p2037_p7 = scmp.ge.s32.totalorder %s2409_s27, 1  ;;  %p249_p8 = scmp.lt.s32.totalorder %s2409_s27, 3 }
   0xc   : > { %p250_p9 = pnand %p2037_p7, %p249_p8 }
   0xd   : > { %s2552_s17 = sshll.u32 (!%p250_p9), %s2476_s28, 5  ;;  %s282_s15 = sand.u32 (!%p250_p9), 1, %s2401_s25  }
   0xe   : > { %253 = sbr.rel (%p250_p9) target bundleno = 770 (0x302), region = 48  ;;  %p290_p10 = scmp.lt.s32.totalorder (!%p250_p9), %s2552_s17, 62 }
   0xf   : > { %s2038_s22 = sshll.u32 (!%p250_p9), %s282_s15, 8 }
  0x10   : > { %s3015_s23 = scalar_lea.vmem (!%p250_p9), [#allocation2], %s2038_s22 }
  0x13   : > { %v2099_v0 = vld [vmem:[%s3578_s1 + $0x70] sm:$0xf]  ;;  %v2193_v1 = vld [vmem:[%s3578_s1 + $0x74] sm:$0xf0]  ;;  %v2192_v2 = vld [vmem:[%s3578_s1 + $0x74] sm:$0xf] }
  0x14   : > { %v2100_v3 = vor.u32 %v2193_v1, %v2099_v0  ;;  %v2101_v4 = vld [vmem:[%s3578_s1 + $0x78] sm:$0xf0]  ;;  %v2091_v5 = vld [vmem:[%s3578_s1 + $0x60] sm:$0xf]  ;;  %v2191_v6 = vld [vmem:[%s3578_s1 + $0x64] sm:$0xf0] }
  0x15   : > { %v2104_v7 = vor.u32 %v2192_v2, %v2101_v4  ;;  %v2190_v8 = vld [vmem:[%s3578_s1 + $0x64] sm:$0xf]  ;;  %v2093_v9 = vld [vmem:[%s3578_s1 + $0x68] sm:$0xf0]  ;;  %v2092_v10 = vor.u32 %v2191_v6, %v2091_v5  ;;  %v2083_v12 = vld [vmem:[%s3578_s1 + $0x50] sm:$0xf] }
  0x16   : > { %454 = vmatpush.bf16.msra.mxu0 %v2100_v3  ;;  %v2096_v11 = vor.u32 %v2190_v8, %v2093_v9  ;;  %v2189_v13 = vld [vmem:[%s3578_s1 + $0x54] sm:$0xf0]  ;;  %v2188_v14 = vld [vmem:[%s3578_s1 + $0x54] sm:$0xf]  ;;  %v2085_v15 = vld [vmem:[%s3578_s1 + $0x58] sm:$0xf0] }
  0x17   : > { %543 = vmatpush.bf16.msra.mxu1 %v2104_v7  ;;  %v2084_v16 = vor.u32 %v2189_v13, %v2083_v12  ;;  %v2088_v17 = vor.u32 %v2188_v14, %v2085_v15  ;;  %v2075_v18 = vld [vmem:[%s3578_s1 + $0x40] sm:$0xf]  ;;  %v2187_v19 = vld [vmem:[%s3578_s1 + $0x44] sm:$0xf0]  ;;  %v2186_v20 = vld [vmem:[%s3578_s1 + $0x44] sm:$0xf] }
  0x18   : > { %v2077_v21 = vld [vmem:[%s3578_s1 + $0x48] sm:$0xf0]  ;;  %v2076_v22 = vor.u32 %v2187_v19, %v2075_v18  ;;  %v2067_v24 = vld [vmem:[%s3578_s1 + $0x30] sm:$0xf]  ;;  %v2185_v25 = vld [vmem:[%s3578_s1 + $0x34] sm:$0xf0] }
  0x19   : > { %v2080_v23 = vor.u32 %v2186_v20, %v2077_v21  ;;  %v2184_v26 = vld [vmem:[%s3578_s1 + $0x34] sm:$0xf]  ;;  %v2069_v27 = vld [vmem:[%s3578_s1 + $0x38] sm:$0xf0]  ;;  %v2068_v28 = vor.u32 %v2185_v25, %v2067_v24  ;;  %v2059_v30 = vld [vmem:[%s3578_s1 + $0x20] sm:$0xf] }
  0x1a   : > { %455 = vmatpush.bf16.msra.mxu0 %v2092_v10  ;;  %v2072_v29 = vor.u32 %v2184_v26, %v2069_v27  ;;  %v2183_v31 = vld [vmem:[%s3578_s1 + $0x24] sm:$0xf0]  ;;  %v2182_v32 = vld [vmem:[%s3578_s1 + $0x24] sm:$0xf]  ;;  %v2061_v33 = vld [vmem:[%s3578_s1 + $0x28] sm:$0xf0] }
  0x1b   : > { %544 = vmatpush.bf16.msra.mxu1 %v2096_v11  ;;  %s291_s21 = scalar_select %p290_p10, %s2552_s17, 62  ;;  %v2060_v34 = vor.u32 %v2183_v31, %v2059_v30  ;;  %v2064_v35 = vor.u32 %v2182_v32, %v2061_v33  ;;  %v2051_v36 = vld [vmem:[%s3578_s1 + $0x10] sm:$0xf]  ;;  %v2181_v37 = vld [vmem:[%s3578_s1 + $0x14] sm:$0xf0]  ;;  %v2199_v6 = vld [vmem:[%s3580_s3 + $0x28] sm:$0xff] }
  0x1c   : > { %v2180_v38 = vld [vmem:[%s3578_s1 + $0x14] sm:$0xf]  ;;  %v2053_v39 = vld [vmem:[%s3578_s1 + $0x18] sm:$0xf0]  ;;  %v2052_v40 = vor.u32 %v2181_v37, %v2051_v36  ;;  %v2043_v42 = vld [vmem:[%s3578_s1] sm:$0xf] }
  0x1d   : > { %s2040_s16 = sshll.u32 %s291_s21, 3  ;;  %v2056_v41 = vor.u32 %v2180_v38, %v2053_v39  ;;  %v2179_v43 = vld [vmem:[%s3578_s1 + $0x4] sm:$0xf0]  ;;  %v2178_v44 = vld [vmem:[%s3578_s1 + $0x4] sm:$0xf]  ;;  %v2201_v63 = vld [vmem:[%s3580_s3 + $0x38] sm:$0xff] }
  0x1e   : > { %456 = vmatpush.bf16.msra.mxu0 %v2084_v16  ;;  %s2601_s8 = scalar_lea.vmem %s3577_s0, %s2040_s16  ;;  %v2045_v45 = vld [vmem:[%s3578_s1 + $0x8] sm:$0xf0]  ;;  %v2044_v46 = vor.u32 %v2179_v43, %v2043_v42  ;;  %v2209_v0 = vld [vmem:[%s3580_s3 + $0x78] sm:$0xff]  ;;  %860 = vmatpush.bf16.msra.mxu2 %v2201_v63  ;;  %v2200_v4 = vld [vmem:[%s3580_s3 + $0x30] sm:$0xff]  ;;  %s3516_s16 = scalar_lea.sflag [#allocation3], %s282_s15 }
  0x1f   : > { %545 = vmatpush.bf16.msra.mxu1 %v2088_v17  ;;  %v2610_v47 = vld [vmem:[%s2601_s8] sm:$0xff]  ;;  %v2613_v48 = vld [vmem:[%s2601_s8 + $0x8] sm:$0xff]  ;;  %v2048_v49 = vor.u32 %v2178_v44, %v2045_v45  ;;  %v2618_v51 = vld [vmem:[%s2601_s8 + $0x10] sm:$0xff]  ;;  %949 = vmatpush.bf16.msra.mxu3 %v2209_v0  ;;  %s1958_s18 = ssub.s32 (%p2493_p5), 63, %s2552_s17 }
  0x20   : > { %v336_v50 = vpack.c.bf16 %v2613_v48, %v2610_v47  ;;  %v2621_v52 = vld [vmem:[%s2601_s8 + $0x18] sm:$0xff]  ;;  %v2626_v54 = vld [vmem:[%s2601_s8 + $0x20] sm:$0xff]  ;;  %v2629_v55 = vld [vmem:[%s2601_s8 + $0x28] sm:$0xff]  ;;  %p1959_p11 = scmp.lt.s32.totalorder (%p2493_p5), %s1958_s18, 32 }
  0x21   : > { %v337_v53 = vpack.c.bf16 %v2621_v52, %v2618_v51  ;;  %v338_v56 = vpack.c.bf16 %v2629_v55, %v2626_v54  ;;  %v2634_v57 = vld [vmem:[%s2601_s8 + $0x30] sm:$0xff]  ;;  %v2637_v58 = vld [vmem:[%s2601_s8 + $0x38] sm:$0xff]  ;;  %v2642_v60 = vld [vmem:[%s2601_s8 + $0x40] sm:$0xff] }
  0x22   : > { %457 = vmatpush.bf16.msra.mxu0 %v2076_v22  ;;  %v339_v59 = vpack.c.bf16 %v2637_v58, %v2634_v57  ;;  %v2645_v61 = vld [vmem:[%s2601_s8 + $0x48] sm:$0xff]  ;;  %v2656_v1 = vld [vmem:[%s2601_s8 + $0x50] sm:$0xff]  ;;  %v2659_v2 = vld [vmem:[%s2601_s8 + $0x58] sm:$0xff]  ;;  %861 = vmatpush.bf16.msra.mxu2 %v2200_v4 }
  0x23   : > { %546 = vmatpush.bf16.msra.mxu1 %v2080_v23  ;;  %v340_v62 = vpack.c.bf16 %v2645_v61, %v2642_v60  ;;  %v341_v3 = vpack.c.bf16 %v2659_v2, %v2656_v1  ;;  %v2208_v5 = vld [vmem:[%s3580_s3 + $0x70] sm:$0xff]  ;;  %v2207_v7 = vld [vmem:[%s3580_s3 + $0x68] sm:$0xff]  ;;  %v2198_v8 = vld [vmem:[%s3580_s3 + $0x20] sm:$0xff] }
  0x24   : > { %950 = vmatpush.bf16.msra.mxu3 %v2208_v5  ;;  %v2206_v9 = vld [vmem:[%s3580_s3 + $0x60] sm:$0xff]  ;;  %v2685_v11 = vld [vmem:[%s2601_s8 + $0x68] sm:$0xff]  ;;  %v2197_v13 = vld [vmem:[%s3580_s3 + $0x18] sm:$0xff] }
  0x25   : > { %v2682_v10 = vld [vmem:[%s2601_s8 + $0x60] sm:$0xff]  ;;  %v2205_v14 = vld [vmem:[%s3580_s3 + $0x58] sm:$0xff]  ;;  %v2196_v15 = vld [vmem:[%s3580_s3 + $0x10] sm:$0xff] }
  0x26   : > { %458 = vmatpush.bf16.msra.mxu0 %v2068_v28  ;;  %862 = vmatpush.bf16.msra.mxu2 %v2199_v6  ;;  %v342_v12 = vpack.c.bf16 %v2685_v11, %v2682_v10  ;;  %v2204_v16 = vld [vmem:[%s3580_s3 + $0x50] sm:$0xff]  ;;  %v2195_v17 = vld [vmem:[%s3580_s3 + $0x8] sm:$0xff]  ;;  %v2194_v19 = vld [vmem:[%s3580_s3] sm:$0xff] }
  0x27   : > { %547 = vmatpush.bf16.msra.mxu1 %v2072_v29  ;;  %v2203_v18 = vld [vmem:[%s3580_s3 + $0x48] sm:$0xff]  ;;  %v2202_v20 = vld [vmem:[%s3580_s3 + $0x40] sm:$0xff]  ;;  %v2714_v21 = vld [vmem:[%s2601_s8 + $0x70] sm:$0xff] }
  0x28   : > { %951 = vmatpush.bf16.msra.mxu3 %v2207_v7  ;;  %v2717_v22 = vld [vmem:[%s2601_s8 + $0x78] sm:$0xff]  ;;  %v2722_v24 = vld [vmem:[%s2601_s8 + $0x80] sm:$0xff]  ;;  %v2725_v25 = vld [vmem:[%s2601_s8 + $0x88] sm:$0xff] }
  0x29   : > { %v343_v23 = vpack.c.bf16 %v2717_v22, %v2714_v21  ;;  %v344_v26 = vpack.c.bf16 %v2725_v25, %v2722_v24  ;;  %v368_v27 = vld [vmem:[%s3579_s2] sm:$0x3]  ;;  %v2741_v42 = vld [vmem:[%s2601_s8 + $0x90] sm:$0xff]  ;;  %v2744_v43 = vld [vmem:[%s2601_s8 + $0x98] sm:$0xff] }
  0x2a   : > { %459 = vmatpush.bf16.msra.mxu0 %v2060_v34  ;;  %863 = vmatpush.bf16.msra.mxu2 %v2198_v8  ;;  %v2732_v30 = vperm.slane %v368_v27, 0  ;;  %v2734_v31 = vperm.slane %v368_v27, 1  ;;  %v324_v7 = vld [vmem:[%s2601_s8 + $0xa0] sm:$0xff]  ;;  %v325_v8 = vld [vmem:[%s2601_s8 + $0xa8] sm:$0xff] }
  0x2b   : > { %548 = vmatpush.bf16.msra.mxu1 %v2064_v35 }
  0x2c   : > { %952 = vmatpush.bf16.msra.mxu3 %v2206_v9 }
  0x2e   : > { %460 = vmatpush.bf16.msra.mxu0 %v2052_v40  ;;  %864 = vmatpush.bf16.msra.mxu2 %v2197_v13  ;;  %v346_v13 = vpack.c.bf16 %v325_v8, %v324_v7 }
  0x2f   : > { %549 = vmatpush.bf16.msra.mxu1 %v2056_v41 }
  0x30   : > { %953 = vmatpush.bf16.msra.mxu3 %v2205_v14 }
  0x32   : > { %461 = vmatpush.bf16.msra.mxu0 %v2044_v46  ;;  %865 = vmatpush.bf16.msra.mxu2 %v2196_v15  ;;  %v345_v46 = vpack.c.bf16 %v2744_v43, %v2741_v42 }
  0x33   : > { %550 = vmatpush.bf16.msra.mxu1 %v2048_v49 }
  0x34   : > { %954 = vmatpush.bf16.msra.mxu3 %v2204_v16 }
  0x35   : > { %462 = vmatmul.bf16.vlgmr.msra.gmra.mxu0 %v336_v50 }
  0x36   : > { %551 = vmatmul.bf16.vlgmr.msra.gmra.mxu1 %v336_v50  ;;  %866 = vmatpush.bf16.msra.mxu2 %v2195_v17 }
  0x38   : > { %955 = vmatpush.bf16.msra.mxu3 %v2203_v18 }
  0x3a   : > { %867 = vmatpush.bf16.msra.mxu2 %v2194_v19 }
  0x3c   : > { %956 = vmatpush.bf16.msra.mxu3 %v2202_v20 }
  0x45   : > { %467 = vmatmul.bf16.gmra.mxu0 %v337_v53 }
  0x46   : > { %556 = vmatmul.bf16.gmra.mxu1 %v337_v53 }
  0x55   : > { %472 = vmatmul.bf16.gmra.mxu0 %v338_v56 }
  0x56   : > { %561 = vmatmul.bf16.gmra.mxu1 %v338_v56 }
  0x65   : > { %477 = vmatmul.bf16.gmra.mxu0 %v339_v59 }
  0x66   : > { %566 = vmatmul.bf16.gmra.mxu1 %v339_v59 }
  0x75   : > { %482 = vmatmul.bf16.gmra.mxu0 %v340_v62 }
  0x76   : > { %571 = vmatmul.bf16.gmra.mxu1 %v340_v62 }
  0x85   : > { %487 = vmatmul.bf16.gmra.mxu0 %v341_v3 }
  0x86   : > { %576 = vmatmul.bf16.gmra.mxu1 %v341_v3 }
  0x95   : > { %492 = vmatmul.bf16.gmra.mxu0 %v342_v12 }
  0x96   : > { %581 = vmatmul.bf16.gmra.mxu1 %v342_v12 }
  0xa5   : > { %497 = vmatmul.bf16.gmra.mxu0 %v343_v23 }
  0xa6   : > { %586 = vmatmul.bf16.gmra.mxu1 %v343_v23 }
  0xb2   : > { %v463_v28 = vpop.f32.mrf.mxu0 }
  0xb3   : > { %v552_v29 = vpop.f32.mrf.mxu1  ;;  %v464_v32 = vadd.f32 %v463_v28, %v2732_v30 }
  0xb4   : > { %v553_v33 = vadd.f32 %v552_v29, %v2734_v31 }
  0xb5   : > { %502 = vmatmul.bf16.gmra.mxu0 %v344_v26  ;;  %v632_v38 = vmax.f32 %v464_v32, 0.0  ;;  %v326_v32 = vld [vmem:[%s2601_s8 + $0xb0] sm:$0xff] }
  0xb6   : > { %591 = vmatmul.bf16.gmra.mxu1 %v344_v26  ;;  %v633_v40 = vmax.f32 %v553_v33, 0.0  ;;  %v327_v33 = vld [vmem:[%s2601_s8 + $0xb8] sm:$0xff] }
  0xba   : > { %v465_v34 = vpop.f32.mrf.mxu0 }
  0xbb   : > { %v466_v35 = vadd.f32 %v465_v34, %v2732_v30  ;;  %v554_v36 = vpop.f32.mrf.mxu1 }
  0xbc   : > { %v555_v37 = vadd.f32 %v554_v36, %v2734_v31  ;;  %v347_v36 = vpack.c.bf16 %v327_v33, %v326_v32 }
  0xbd   : > { %v634_v39 = vmax.f32 %v466_v35, 0.0 }
  0xbe   : > { %v635_v41 = vmax.f32 %v555_v37, 0.0 }
  0xbf   : > { %v696_v44 = vpack.c.bf16 %v634_v39, %v632_v38 }
  0xc0   : > { %v697_v45 = vpack.c.bf16 %v635_v41, %v633_v40 }
  0xc1   : > { %868 = vmatmul.bf16.vlgmr.msra.gmra.mxu2 %v696_v44 }
  0xc2   : > { %957 = vmatmul.bf16.vlgmr.msra.gmra.mxu3 %v697_v45  ;;  %v468_v49 = vpop.f32.mrf.mxu0 }
  0xc3   : > { %v557_v50 = vpop.f32.mrf.mxu1  ;;  %v469_v53 = vadd.f32 %v468_v49, %v2732_v30 }
  0xc4   : > { %v558_v56 = vadd.f32 %v557_v50, %v2734_v31 }
  0xc5   : > { %507 = vmatmul.bf16.gmra.mxu0 %v345_v46  ;;  %v636_v3 = vmax.f32 %v469_v53, 0.0 }
  0xc6   : > { %596 = vmatmul.bf16.gmra.mxu1 %v345_v46  ;;  %v637_v5 = vmax.f32 %v558_v56, 0.0 }
  0xca   : > { %v470_v59 = vpop.f32.mrf.mxu0 }
  0xcb   : > { %v471_v62 = vadd.f32 %v470_v59, %v2732_v30  ;;  %v559_v63 = vpop.f32.mrf.mxu1  ;;  %v328_v59 = vld [vmem:[%s2601_s8 + $0xc0] sm:$0xff] }
  0xcc   : > { %v560_v0 = vadd.f32 %v559_v63, %v2734_v31 }
  0xcd   : > { %v638_v4 = vmax.f32 %v471_v62, 0.0  ;;  %v329_v62 = vld [vmem:[%s2601_s8 + $0xc8] sm:$0xff] }
  0xce   : > { %v639_v6 = vmax.f32 %v560_v0, 0.0 }
  0xcf   : > { %v698_v9 = vpack.c.bf16 %v638_v4, %v636_v3  ;;  %v348_v3 = vpack.c.bf16 %v329_v62, %v328_v59 }
  0xd0   : > { %v699_v12 = vpack.c.bf16 %v639_v6, %v637_v5 }
  0xd1   : > { %873 = vmatmul.bf16.gmra.mxu2 %v698_v9 }
  0xd2   : > { %962 = vmatmul.bf16.gmra.mxu3 %v699_v12  ;;  %v473_v14 = vpop.f32.mrf.mxu0 }
  0xd3   : > { %v562_v15 = vpop.f32.mrf.mxu1  ;;  %v474_v16 = vadd.f32 %v473_v14, %v2732_v30 }
  0xd4   : > { %v563_v17 = vadd.f32 %v562_v15, %v2734_v31 }
  0xd5   : > { %512 = vmatmul.bf16.gmra.mxu0 %v346_v13  ;;  %v640_v26 = vmax.f32 %v474_v16, 0.0 }
  0xd6   : > { %601 = vmatmul.bf16.gmra.mxu1 %v346_v13  ;;  %v641_v28 = vmax.f32 %v563_v17, 0.0 }
  0xda   : > { %v475_v18 = vpop.f32.mrf.mxu0 }
  0xdb   : > { %v476_v19 = vadd.f32 %v475_v18, %v2732_v30  ;;  %v564_v20 = vpop.f32.mrf.mxu1  ;;  %v330_v18 = vld [vmem:[%s2601_s8 + $0xd0] sm:$0xff] }
  0xdc   : > { %v565_v23 = vadd.f32 %v564_v20, %v2734_v31 }
  0xdd   : > { %v642_v27 = vmax.f32 %v476_v19, 0.0  ;;  %v331_v19 = vld [vmem:[%s2601_s8 + $0xd8] sm:$0xff] }
  0xde   : > { %v643_v29 = vmax.f32 %v565_v23, 0.0 }
  0xdf   : > { %v700_v34 = vpack.c.bf16 %v642_v27, %v640_v26  ;;  %v349_v26 = vpack.c.bf16 %v331_v19, %v330_v18 }
  0xe0   : > { %v701_v35 = vpack.c.bf16 %v643_v29, %v641_v28 }
  0xe1   : > { %878 = vmatmul.bf16.gmra.mxu2 %v700_v34 }
  0xe2   : > { %967 = vmatmul.bf16.gmra.mxu3 %v701_v35  ;;  %v478_v37 = vpop.f32.mrf.mxu0 }
  0xe3   : > { %v567_v38 = vpop.f32.mrf.mxu1  ;;  %v479_v39 = vadd.f32 %v478_v37, %v2732_v30 }
  0xe4   : > { %v568_v40 = vadd.f32 %v567_v38, %v2734_v31 }
  0xe5   : > { %517 = vmatmul.bf16.gmra.mxu0 %v347_v36  ;;  %v644_v49 = vmax.f32 %v479_v39, 0.0 }
  0xe6   : > { %606 = vmatmul.bf16.gmra.mxu1 %v347_v36  ;;  %v645_v53 = vmax.f32 %v568_v40, 0.0 }
  0xea   : > { %v480_v41 = vpop.f32.mrf.mxu0 }
  0xeb   : > { %v481_v44 = vadd.f32 %v480_v41, %v2732_v30  ;;  %v569_v45 = vpop.f32.mrf.mxu1  ;;  %v332_v41 = vld [vmem:[%s2601_s8 + $0xe0] sm:$0xff] }
  0xec   : > { %v570_v46 = vadd.f32 %v569_v45, %v2734_v31 }
  0xed   : > { %v646_v50 = vmax.f32 %v481_v44, 0.0  ;;  %v333_v44 = vld [vmem:[%s2601_s8 + $0xe8] sm:$0xff] }
  0xee   : > { %v647_v56 = vmax.f32 %v570_v46, 0.0 }
  0xef   : > { %v702_v63 = vpack.c.bf16 %v646_v50, %v644_v49  ;;  %v350_v49 = vpack.c.bf16 %v333_v44, %v332_v41 }
  0xf0   : > { %v703_v0 = vpack.c.bf16 %v647_v56, %v645_v53 }
  0xf1   : > { %883 = vmatmul.bf16.gmra.mxu2 %v702_v63 }
  0xf2   : > { %972 = vmatmul.bf16.gmra.mxu3 %v703_v0  ;;  %v483_v4 = vpop.f32.mrf.mxu0 }
  0xf3   : > { %v572_v5 = vpop.f32.mrf.mxu1  ;;  %v484_v6 = vadd.f32 %v483_v4, %v2732_v30 }
  0xf4   : > { %v573_v7 = vadd.f32 %v572_v5, %v2734_v31 }
  0xf5   : > { %522 = vmatmul.bf16.gmra.mxu0 %v348_v3  ;;  %v648_v14 = vmax.f32 %v484_v6, 0.0 }
  0xf6   : > { %611 = vmatmul.bf16.gmra.mxu1 %v348_v3  ;;  %v649_v16 = vmax.f32 %v573_v7, 0.0 }
  0xfa   : > { %v485_v8 = vpop.f32.mrf.mxu0 }
  0xfb   : > { %v486_v9 = vadd.f32 %v485_v8, %v2732_v30  ;;  %v574_v12 = vpop.f32.mrf.mxu1  ;;  %v334_v8 = vld [vmem:[%s2601_s8 + $0xf0] sm:$0xff] }
  0xfc   : > { %v575_v13 = vadd.f32 %v574_v12, %v2734_v31 }
  0xfd   : > { %v650_v15 = vmax.f32 %v486_v9, 0.0  ;;  %v335_v9 = vld [vmem:[%s2601_s8 + $0xf8] sm:$0xff] }
  0xfe   : > { %v651_v17 = vmax.f32 %v575_v13, 0.0 }
  0xff   : > { %v704_v20 = vpack.c.bf16 %v650_v15, %v648_v14  ;;  %v351_v14 = vpack.c.bf16 %v335_v9, %v334_v8 }
 0x100   : > { %v705_v23 = vpack.c.bf16 %v651_v17, %v649_v16 }
 0x101   : > { %888 = vmatmul.bf16.gmra.mxu2 %v704_v20 }
 0x102   : > { %977 = vmatmul.bf16.gmra.mxu3 %v705_v23  ;;  %v488_v27 = vpop.f32.mrf.mxu0 }
 0x103   : > { %v577_v28 = vpop.f32.mrf.mxu1  ;;  %v489_v29 = vadd.f32 %v488_v27, %v2732_v30 }
 0x104   : > { %v578_v32 = vadd.f32 %v577_v28, %v2734_v31 }
 0x105   : > { %527 = vmatmul.bf16.gmra.mxu0 %v349_v26  ;;  %v652_v37 = vmax.f32 %v489_v29, 0.0 }
 0x106   : > { %616 = vmatmul.bf16.gmra.mxu1 %v349_v26  ;;  %v653_v39 = vmax.f32 %v578_v32, 0.0 }
 0x10a   : > { %v490_v33 = vpop.f32.mrf.mxu0 }
 0x10b   : > { %v491_v34 = vadd.f32 %v490_v33, %v2732_v30  ;;  %v579_v35 = vpop.f32.mrf.mxu1 }
 0x10c   : > { %v580_v36 = vadd.f32 %v579_v35, %v2734_v31 }
 0x10d   : > { %v654_v38 = vmax.f32 %v491_v34, 0.0 }
 0x10e   : > { %v655_v40 = vmax.f32 %v580_v36, 0.0 }
 0x10f   : > { %v706_v45 = vpack.c.bf16 %v654_v38, %v652_v37 }
 0x110   : > { %v707_v46 = vpack.c.bf16 %v655_v40, %v653_v39 }
 0x111   : > { %893 = vmatmul.bf16.gmra.mxu2 %v706_v45 }
 0x112   : > { %982 = vmatmul.bf16.gmra.mxu3 %v707_v46  ;;  %v493_v50 = vpop.f32.mrf.mxu0 }
 0x113   : > { %v582_v53 = vpop.f32.mrf.mxu1  ;;  %v494_v56 = vadd.f32 %v493_v50, %v2732_v30 }
 0x114   : > { %v583_v59 = vadd.f32 %v582_v53, %v2734_v31 }
 0x115   : > { %532 = vmatmul.bf16.gmra.mxu0 %v350_v49  ;;  %v656_v4 = vmax.f32 %v494_v56, 0.0 }
 0x116   : > { %621 = vmatmul.bf16.gmra.mxu1 %v350_v49  ;;  %v657_v6 = vmax.f32 %v583_v59, 0.0  ;;  %v2795_v59 = vld [vmem:[%s3581_s4] ss:$0 sm:$0xff] }
 0x11a   : > { %v495_v62 = vpop.f32.mrf.mxu0 }
 0x11b   : > { %v496_v63 = vadd.f32 %v495_v62, %v2732_v30  ;;  %v584_v0 = vpop.f32.mrf.mxu1 }
 0x11c   : > { %v585_v3 = vadd.f32 %v584_v0, %v2734_v31 }
 0x11d   : > { %v658_v5 = vmax.f32 %v496_v63, 0.0 }
 0x11e   : > { %v659_v7 = vmax.f32 %v585_v3, 0.0 }
 0x11f   : > { %v708_v12 = vpack.c.bf16 %v658_v5, %v656_v4 }
 0x120   : > { %v709_v13 = vpack.c.bf16 %v659_v7, %v657_v6 }
 0x121   : > { %898 = vmatmul.bf16.gmra.mxu2 %v708_v12 }
 0x122   : > { %987 = vmatmul.bf16.gmra.mxu3 %v709_v13  ;;  %v498_v15 = vpop.f32.mrf.mxu0 }
 0x123   : > { %v587_v16 = vpop.f32.mrf.mxu1  ;;  %v499_v17 = vadd.f32 %v498_v15, %v2732_v30 }
 0x124   : > { %v588_v18 = vadd.f32 %v587_v16, %v2734_v31 }
 0x125   : > { %537 = vmatmul.bf16.gmra.mxu0 %v351_v14  ;;  %v660_v27 = vmax.f32 %v499_v17, 0.0 }
 0x126   : > { %626 = vmatmul.bf16.gmra.mxu1 %v351_v14  ;;  %v661_v29 = vmax.f32 %v588_v18, 0.0 }
 0x12a   : > { %v500_v19 = vpop.f32.mrf.mxu0 }
 0x12b   : > { %v501_v20 = vadd.f32 %v500_v19, %v2732_v30  ;;  %v589_v23 = vpop.f32.mrf.mxu1 }
 0x12c   : > { %v590_v26 = vadd.f32 %v589_v23, %v2734_v31 }
 0x12d   : > { %v662_v28 = vmax.f32 %v501_v20, 0.0 }
 0x12e   : > { %v663_v32 = vmax.f32 %v590_v26, 0.0 }
 0x12f   : > { %v710_v33 = vpack.c.bf16 %v662_v28, %v660_v27 }
 0x130   : > { %v711_v34 = vpack.c.bf16 %v663_v32, %v661_v29 }
 0x131   : > { %903 = vmatmul.bf16.gmra.mxu2 %v710_v33 }
 0x132   : > { %992 = vmatmul.bf16.gmra.mxu3 %v711_v34  ;;  %v503_v35 = vpop.f32.mrf.mxu0 }
 0x133   : > { %v592_v36 = vpop.f32.mrf.mxu1  ;;  %v504_v37 = vadd.f32 %v503_v35, %v2732_v30 }
 0x134   : > { %v593_v38 = vadd.f32 %v592_v36, %v2734_v31 }
 0x135   : > { %v664_v45 = vmax.f32 %v504_v37, 0.0 }
 0x136   : > { %v665_v49 = vmax.f32 %v593_v38, 0.0 }
 0x13a   : > { %v505_v39 = vpop.f32.mrf.mxu0 }
 0x13b   : > { %v506_v40 = vadd.f32 %v505_v39, %v2732_v30  ;;  %v594_v41 = vpop.f32.mrf.mxu1 }
 0x13c   : > { %v595_v44 = vadd.f32 %v594_v41, %v2734_v31 }
 0x13d   : > { %v666_v46 = vmax.f32 %v506_v40, 0.0 }
 0x13e   : > { %v667_v50 = vmax.f32 %v595_v44, 0.0 }
 0x13f   : > { %v712_v53 = vpack.c.bf16 %v666_v46, %v664_v45 }
 0x140   : > { %v713_v56 = vpack.c.bf16 %v667_v50, %v665_v49 }
 0x141   : > { %908 = vmatmul.bf16.gmra.mxu2 %v712_v53 }
 0x142   : > { %997 = vmatmul.bf16.gmra.mxu3 %v713_v56  ;;  %v508_v62 = vpop.f32.mrf.mxu0 }
 0x143   : > { %v597_v63 = vpop.f32.mrf.mxu1  ;;  %v509_v6 = vadd.f32 %v508_v62, %v2732_v30 }
 0x144   : > { %v869_v0 = vpop.f32.mrf.mxu2  ;;  %v598_v8 = vadd.f32 %v597_v63, %v2734_v31 }
 0x145   : > { %v870_v3 = vadd.f32 %v2795_v59, %v869_v0  ;;  %v958_v4 = vpop.f32.mrf.mxu3  ;;  %v668_v17 = vmax.f32 %v509_v6, 0.0 }
 0x146   : > { %v669_v20 = vmax.f32 %v598_v8, 0.0 }
 0x147   : > { %v959_v5 = vadd.f32 %v958_v4, %v870_v3 }
 0x149   : > { %v2800_v7 = vadd.f32 %v959_v5, %v2610_v47 }
 0x14a   : > { %v510_v9 = vpop.f32.mrf.mxu0 }
 0x14b   : > { %v511_v12 = vadd.f32 %v510_v9, %v2732_v30  ;;  %v599_v13 = vpop.f32.mrf.mxu1  ;;  %1072 = vadd.xlane.f32.xlu0 %v2800_v7  ;;  %v1175_v14 = vmul.f32 %v2800_v7, %v2800_v7 }
 0x14c   : > { %v600_v15 = vadd.f32 %v599_v13, %v2734_v31  ;;  %v871_v16 = vpop.f32.mrf.mxu2 }
 0x14d   : > { %v670_v18 = vmax.f32 %v511_v12, 0.0  ;;  %v872_v19 = vadd.f32 %v2795_v59, %v871_v16  ;;  %v960_v47 = vpop.f32.mrf.mxu3  ;;  %1207 = vadd.xlane.f32.xlu2 %v1175_v14 }
 0x14e   : > { %v671_v23 = vmax.f32 %v600_v15, 0.0 }
 0x14f   : > { %v961_v26 = vadd.f32 %v960_v47, %v872_v19  ;;  %v714_v27 = vpack.c.bf16 %v670_v18, %v668_v17 }
 0x150   : > { %v715_v28 = vpack.c.bf16 %v671_v23, %v669_v20 }
 0x151   : > { %v2810_v29 = vadd.f32 %v961_v26, %v2613_v48  ;;  %913 = vmatmul.bf16.gmra.mxu2 %v714_v27 }
 0x152   : > { %1002 = vmatmul.bf16.gmra.mxu3 %v715_v28  ;;  %v513_v32 = vpop.f32.mrf.mxu0 }
 0x153   : > { %v602_v33 = vpop.f32.mrf.mxu1  ;;  %1074 = vadd.xlane.f32.xlu0 %v2810_v29  ;;  %v514_v38 = vadd.f32 %v513_v32, %v2732_v30  ;;  %v1176_v48 = vmul.f32 %v2810_v29, %v2810_v29 }
 0x154   : > { %v874_v34 = vpop.f32.mrf.mxu2  ;;  %v603_v40 = vadd.f32 %v602_v33, %v2734_v31 }
 0x155   : > { %v875_v35 = vadd.f32 %v2795_v59, %v874_v34  ;;  %v963_v36 = vpop.f32.mrf.mxu3  ;;  %v672_v50 = vmax.f32 %v514_v38, 0.0 }
 0x156   : > { %v673_v62 = vmax.f32 %v603_v40, 0.0 }
 0x157   : > { %v964_v37 = vadd.f32 %v963_v36, %v875_v35 }
 0x159   : > { %v2816_v39 = vadd.f32 %v964_v37, %v2618_v51 }
 0x15a   : > { %v515_v41 = vpop.f32.mrf.mxu0 }
 0x15b   : > { %v516_v44 = vadd.f32 %v515_v41, %v2732_v30  ;;  %v604_v45 = vpop.f32.mrf.mxu1  ;;  %1076 = vadd.xlane.f32.xlu1 %v2816_v39  ;;  %1209 = vadd.xlane.f32.xlu0 %v1176_v48  ;;  %v1177_v6 = vmul.f32 %v2816_v39, %v2816_v39 }
 0x15c   : > { %v605_v46 = vadd.f32 %v604_v45, %v2734_v31  ;;  %v876_v49 = vpop.f32.mrf.mxu2 }
 0x15d   : > { %v674_v53 = vmax.f32 %v516_v44, 0.0  ;;  %v877_v51 = vadd.f32 %v2795_v59, %v876_v49  ;;  %v965_v56 = vpop.f32.mrf.mxu3 }
 0x15e   : > { %v675_v63 = vmax.f32 %v605_v46, 0.0 }
 0x15f   : > { %v966_v0 = vadd.f32 %v965_v56, %v877_v51  ;;  %v716_v3 = vpack.c.bf16 %v674_v53, %v672_v50 }
 0x160   : > { %v717_v4 = vpack.c.bf16 %v675_v63, %v673_v62 }
 0x161   : > { %v2826_v5 = vadd.f32 %v966_v0, %v2621_v52  ;;  %918 = vmatmul.bf16.gmra.mxu2 %v716_v3 }
 0x162   : > { %1007 = vmatmul.bf16.gmra.mxu3 %v717_v4  ;;  %v518_v8 = vpop.f32.mrf.mxu0 }
 0x163   : > { %v607_v9 = vpop.f32.mrf.mxu1  ;;  %1211 = vadd.xlane.f32.xlu1 %v1177_v6  ;;  %v1178_v12 = vmul.f32 %v2826_v5, %v2826_v5  ;;  %v519_v52 = vadd.f32 %v518_v8, %v2732_v30 }
 0x164   : > { %v879_v13 = vpop.f32.mrf.mxu2  ;;  %v608_v18 = vadd.f32 %v607_v9, %v2734_v31 }
 0x165   : > { %v880_v14 = vadd.f32 %v2795_v59, %v879_v13  ;;  %v968_v15 = vpop.f32.mrf.mxu3  ;;  %1213 = vadd.xlane.f32.xlu2 %v1178_v12  ;;  %v676_v28 = vmax.f32 %v519_v52, 0.0 }
 0x166   : > { %v677_v34 = vmax.f32 %v608_v18, 0.0 }
 0x167   : > { %v969_v16 = vadd.f32 %v968_v15, %v880_v14 }
 0x169   : > { %v2836_v17 = vadd.f32 %v969_v16, %v2626_v54 }
 0x16a   : > { %v520_v19 = vpop.f32.mrf.mxu0 }
 0x16b   : > { %v521_v47 = vadd.f32 %v520_v19, %v2732_v30  ;;  %v609_v20 = vpop.f32.mrf.mxu1  ;;  %1078 = vadd.xlane.f32.xlu1 %v2826_v5  ;;  %v1179_v23 = vmul.f32 %v2836_v17, %v2836_v17 }
 0x16c   : > { %v610_v26 = vadd.f32 %v609_v20, %v2734_v31  ;;  %v881_v27 = vpop.f32.mrf.mxu2 }
 0x16d   : > { %v678_v32 = vmax.f32 %v521_v47, 0.0  ;;  %v882_v33 = vadd.f32 %v2795_v59, %v881_v27  ;;  %v970_v54 = vpop.f32.mrf.mxu3  ;;  %1215 = vadd.xlane.f32.xlu0 %v1179_v23  ;;  %1080 = vadd.xlane.f32.xlu2 %v2836_v17 }
 0x16e   : > { %v679_v35 = vmax.f32 %v610_v26, 0.0 }
 0x16f   : > { %v971_v36 = vadd.f32 %v970_v54, %v882_v33  ;;  %v718_v37 = vpack.c.bf16 %v678_v32, %v676_v28 }
 0x170   : > { %v719_v38 = vpack.c.bf16 %v679_v35, %v677_v34 }
 0x171   : > { %v2847_v48 = vadd.f32 %v971_v36, %v2629_v55  ;;  %923 = vmatmul.bf16.gmra.mxu2 %v718_v37 }
 0x172   : > { %1012 = vmatmul.bf16.gmra.mxu3 %v719_v38  ;;  %v523_v40 = vpop.f32.mrf.mxu0 }
 0x173   : > { %v612_v41 = vpop.f32.mrf.mxu1  ;;  %v1180_v44 = vmul.f32 %v2847_v48, %v2847_v48  ;;  %v524_v53 = vadd.f32 %v523_v40, %v2732_v30 }
 0x174   : > { %v884_v45 = vpop.f32.mrf.mxu2  ;;  %v613_v51 = vadd.f32 %v612_v41, %v2734_v31 }
 0x175   : > { %v885_v46 = vadd.f32 %v2795_v59, %v884_v45  ;;  %v973_v49 = vpop.f32.mrf.mxu3  ;;  %1217 = vadd.xlane.f32.xlu1 %v1180_v44  ;;  %1082 = vadd.xlane.f32.xlu2 %v2847_v48  ;;  %v680_v6 = vmax.f32 %v524_v53, 0.0 }
 0x176   : > { %v681_v12 = vmax.f32 %v613_v51, 0.0 }
 0x177   : > { %v974_v50 = vadd.f32 %v973_v49, %v885_v46 }
 0x179   : > { %v2855_v55 = vadd.f32 %v974_v50, %v2634_v57 }
 0x17a   : > { %v525_v56 = vpop.f32.mrf.mxu0 }
 0x17b   : > { %v526_v62 = vadd.f32 %v525_v56, %v2732_v30  ;;  %v614_v63 = vpop.f32.mrf.mxu1  ;;  %1084 = vadd.xlane.f32.xlu0 %v2855_v55  ;;  %v1181_v0 = vmul.f32 %v2855_v55, %v2855_v55 }
 0x17c   : > { %v615_v3 = vadd.f32 %v614_v63, %v2734_v31  ;;  %v886_v4 = vpop.f32.mrf.mxu2 }
 0x17d   : > { %v682_v8 = vmax.f32 %v526_v62, 0.0  ;;  %v887_v9 = vadd.f32 %v2795_v59, %v886_v4  ;;  %v975_v57 = vpop.f32.mrf.mxu3  ;;  %1219 = vadd.xlane.f32.xlu2 %v1181_v0 }
 0x17e   : > { %v683_v13 = vmax.f32 %v615_v3, 0.0 }
 0x17f   : > { %v720_v14 = vpack.c.bf16 %v682_v8, %v680_v6  ;;  %v976_v15 = vadd.f32 %v975_v57, %v887_v9 }
 0x180   : > { %v721_v16 = vpack.c.bf16 %v683_v13, %v681_v12 }
 0x181   : > { %v2865_v52 = vadd.f32 %v976_v15, %v2637_v58  ;;  %928 = vmatmul.bf16.gmra.mxu2 %v720_v14 }
 0x182   : > { %1017 = vmatmul.bf16.gmra.mxu3 %v721_v16  ;;  %v528_v18 = vpop.f32.mrf.mxu0 }
 0x183   : > { %v617_v19 = vpop.f32.mrf.mxu1  ;;  %1086 = vadd.xlane.f32.xlu1 %v2865_v52  ;;  %v1182_v47 = vmul.f32 %v2865_v52, %v2865_v52  ;;  %v529_v28 = vadd.f32 %v528_v18, %v2732_v30 }
 0x184   : > { %v889_v20 = vpop.f32.mrf.mxu2  ;;  %v618_v32 = vadd.f32 %v617_v19, %v2734_v31 }
 0x185   : > { %v890_v23 = vadd.f32 %v2795_v59, %v889_v20  ;;  %v978_v26 = vpop.f32.mrf.mxu3  ;;  %1221 = vadd.xlane.f32.xlu0 %v1182_v47  ;;  %v684_v38 = vmax.f32 %v529_v28, 0.0 }
 0x186   : > { %v685_v44 = vmax.f32 %v618_v32, 0.0 }
 0x187   : > { %v979_v27 = vadd.f32 %v978_v26, %v890_v23 }
 0x189   : > { %v2873_v58 = vadd.f32 %v979_v27, %v2642_v60 }
 0x18a   : > { %v530_v33 = vpop.f32.mrf.mxu0 }
 0x18b   : > { %v531_v54 = vadd.f32 %v530_v33, %v2732_v30  ;;  %v619_v34 = vpop.f32.mrf.mxu1  ;;  %1088 = vadd.xlane.f32.xlu2 %v2873_v58  ;;  %v1183_v35 = vmul.f32 %v2873_v58, %v2873_v58 }
 0x18c   : > { %v620_v36 = vadd.f32 %v619_v34, %v2734_v31  ;;  %v891_v37 = vpop.f32.mrf.mxu2  ;;  %v2411_v34 = vmov 128.0  }
 0x18d   : > { %v686_v40 = vmax.f32 %v531_v54, 0.0  ;;  %v892_v41 = vadd.f32 %v2795_v59, %v891_v37  ;;  %v980_v60 = vpop.f32.mrf.mxu3  ;;  %1223 = vadd.xlane.f32.xlu1 %v1183_v35  ;;  %2255 = vrcp.f32 %v2411_v34 }
 0x18e   : > { %v687_v45 = vmax.f32 %v620_v36, 0.0 }
 0x18f   : > { %v722_v46 = vpack.c.bf16 %v686_v40, %v684_v38  ;;  %v981_v49 = vadd.f32 %v980_v60, %v892_v41 }
 0x190   : > { %v723_v50 = vpack.c.bf16 %v687_v45, %v685_v44 }
 0x191   : > { %v2883_v53 = vadd.f32 %v981_v49, %v2645_v61  ;;  %933 = vmatmul.bf16.gmra.mxu2 %v722_v46 }
 0x192   : > { %1022 = vmatmul.bf16.gmra.mxu3 %v723_v50  ;;  %v533_v51 = vpop.f32.mrf.mxu0 }
 0x193   : > { %v622_v56 = vpop.f32.mrf.mxu1  ;;  %1090 = vadd.xlane.f32.xlu0 %v2883_v53  ;;  %v1184_v62 = vmul.f32 %v2883_v53, %v2883_v53  ;;  %v534_v6 = vadd.f32 %v533_v51, %v2732_v30  ;;  %v2256_v40 = vpop.eup %2255 }
 0x194   : > { %v894_v63 = vpop.f32.mrf.mxu2  ;;  %v623_v8 = vadd.f32 %v622_v56, %v2734_v31  ;;  %v1137_v56 = vmul.f32 128.0, %v2256_v40  ;;  %vm1141_vm0 = vweird.f32 %v2256_v40 }
 0x195   : > { %v895_v0 = vadd.f32 %v2795_v59, %v894_v63  ;;  %v983_v3 = vpop.f32.mrf.mxu3  ;;  %1225 = vadd.xlane.f32.xlu2 %v1184_v62  ;;  %v688_v16 = vmax.f32 %v534_v6, 0.0 }
 0x196   : > { %v689_v47 = vmax.f32 %v623_v8, 0.0 }
 0x197   : > { %v984_v4 = vadd.f32 %v983_v3, %v895_v0 }
 0x199   : > { %v2891_v61 = vadd.f32 %v984_v4, %v2656_v1 }
 0x19a   : > { %v535_v9 = vpop.f32.mrf.mxu0 }
 0x19b   : > { %v536_v57 = vadd.f32 %v535_v9, %v2732_v30  ;;  %v624_v12 = vpop.f32.mrf.mxu1  ;;  %1092 = vadd.xlane.f32.xlu1 %v2891_v61  ;;  %v1185_v13 = vmul.f32 %v2891_v61, %v2891_v61  ;;  %v1138_v9 = vsub.f32 1.0, %v1137_v56 }
 0x19c   : > { %v625_v14 = vadd.f32 %v624_v12, %v2734_v31  ;;  %v896_v15 = vpop.f32.mrf.mxu2 }
 0x19d   : > { %v690_v18 = vmax.f32 %v536_v57, 0.0  ;;  %v897_v19 = vadd.f32 %v2795_v59, %v896_v15  ;;  %v985_v1 = vpop.f32.mrf.mxu3  ;;  %1227 = vadd.xlane.f32.xlu0 %v1185_v13  ;;  %v1139_v13 = vmul.f32 %v2256_v40, %v1138_v9 }
 0x19e   : > { %v691_v20 = vmax.f32 %v625_v14, 0.0 }
 0x19f   : > { %v724_v23 = vpack.c.bf16 %v690_v18, %v688_v16  ;;  %v986_v26 = vadd.f32 %v985_v1, %v897_v19  ;;  %v1140_v18 = vadd.f32 %v2256_v40, %v1139_v13 }
 0x1a0   : > { %v725_v27 = vpack.c.bf16 %v691_v20, %v689_v47 }
 0x1a1   : > { %v2901_v28 = vadd.f32 %v986_v26, %v2659_v2  ;;  %938 = vmatmul.bf16.gmra.mxu2 %v724_v23  ;;  %v2931_v47 = vsel %vm1141_vm0, %v2256_v40, %v1140_v18 }
 0x1a2   : > { %1027 = vmatmul.bf16.gmra.mxu3 %v725_v27  ;;  %v538_v32 = vpop.f32.mrf.mxu0 }
 0x1a3   : > { %v627_v33 = vpop.f32.mrf.mxu1  ;;  %1094 = vadd.xlane.f32.xlu2 %v2901_v28  ;;  %v1186_v54 = vmul.f32 %v2901_v28, %v2901_v28  ;;  %v539_v2 = vadd.f32 %v538_v32, %v2732_v30 }
 0x1a4   : > { %v899_v35 = vpop.f32.mrf.mxu2  ;;  %v628_v60 = vadd.f32 %v627_v33, %v2734_v31 }
 0x1a5   : > { %v900_v36 = vadd.f32 %v2795_v59, %v899_v35  ;;  %v988_v37 = vpop.f32.mrf.mxu3  ;;  %1229 = vadd.xlane.f32.xlu1 %v1186_v54  ;;  %v692_v62 = vmax.f32 %v539_v2, 0.0 }
 0x1a6   : > { %v693_v3 = vmax.f32 %v628_v60, 0.0 }
 0x1a7   : > { %v989_v38 = vadd.f32 %v988_v37, %v900_v36 }
 0x1a9   : > { %v2909_v41 = vadd.f32 %v989_v38, %v2682_v10 }
 0x1aa   : > { %v540_v44 = vpop.f32.mrf.mxu0 }
 0x1ab   : > { %v541_v45 = vadd.f32 %v540_v44, %v2732_v30  ;;  %v629_v46 = vpop.f32.mrf.mxu1  ;;  %1096 = vadd.xlane.f32.xlu0 %v2909_v41  ;;  %v1187_v49 = vmul.f32 %v2909_v41, %v2909_v41 }
 0x1ac   : > { %v630_v50 = vadd.f32 %v629_v46, %v2734_v31  ;;  %v901_v51 = vpop.f32.mrf.mxu2 }
 0x1ad   : > { %v694_v63 = vmax.f32 %v541_v45, 0.0  ;;  %v902_v10 = vadd.f32 %v2795_v59, %v901_v51  ;;  %v990_v0 = vpop.f32.mrf.mxu3  ;;  %1231 = vadd.xlane.f32.xlu2 %v1187_v49 }
 0x1ae   : > { %v695_v4 = vmax.f32 %v630_v50, 0.0 }
 0x1af   : > { %v726_v6 = vpack.c.bf16 %v694_v63, %v692_v62  ;;  %v991_v30 = vadd.f32 %v990_v0, %v902_v10 }
 0x1b0   : > { %v727_v8 = vpack.c.bf16 %v695_v4, %v693_v3 }
 0x1b1   : > { %v2919_v57 = vadd.f32 %v991_v30, %v2685_v11  ;;  %943 = vmatmul.bf16.gmra.mxu2 %v726_v6 }
 0x1b2   : > { %1032 = vmatmul.bf16.gmra.mxu3 %v727_v8 }
 0x1b3   : > { %1098 = vadd.xlane.f32.xlu1 %v2919_v57  ;;  %v1188_v31 = vmul.f32 %v2919_v57, %v2919_v57 }
 0x1b4   : > { %v904_v12 = vpop.f32.mrf.mxu2 }
 0x1b5   : > { %v905_v14 = vadd.f32 %v2795_v59, %v904_v12  ;;  %v993_v15 = vpop.f32.mrf.mxu3  ;;  %1233 = vadd.xlane.f32.xlu0 %v1188_v31 }
 0x1b7   : > { %v994_v16 = vadd.f32 %v993_v15, %v905_v14 }
 0x1b9   : > { %v2926_v19 = vadd.f32 %v994_v16, %v2714_v21 }
 0x1bb   : > { %1100 = vadd.xlane.f32.xlu2 %v2926_v19  ;;  %v1189_v11 = vmul.f32 %v2926_v19, %v2926_v19 }
 0x1bc   : > { %v906_v1 = vpop.f32.mrf.mxu2 }
 0x1bd   : > { %v907_v20 = vadd.f32 %v2795_v59, %v906_v1  ;;  %v995_v23 = vpop.f32.mrf.mxu3  ;;  %1235 = vadd.xlane.f32.xlu1 %v1189_v11 }
 0x1be   : > { %v1073_v26 = vpop.xlane.xlu0 %1072 }
 0x1bf   : > { %v996_v27 = vadd.f32 %v995_v23, %v907_v20  ;;  %v2935_v32 = vmul.f32 %v2931_v47, %v1073_v26 }
 0x1c0   : > { %v1208_v21 = vpop.xlane.xlu2 %1207 }
 0x1c1   : > { %v2938_v33 = vadd.f32 %v996_v27, %v2717_v22  ;;  %v1303_v54 = vmul.f32 %v2935_v32, %v2935_v32  ;;  %v1271_v34 = vmul.f32 %v1208_v21, %v2931_v47  ;;  %v1399_v21 = vsub.f32 %v2800_v7, %v2935_v32 }
 0x1c3   : > { %v1335_v35 = vsub.f32 %v1271_v34, %v1303_v54  ;;  %1102 = vadd.xlane.f32.xlu0 %v2938_v33  ;;  %v1190_v36 = vmul.f32 %v2938_v33, %v2938_v33  ;;  %v2981_v54 = vld [vmem:[%s3582_s5] ss:$0 sm:$0xff] }
 0x1c4   : > { %v909_v37 = vpop.f32.mrf.mxu2 }
 0x1c5   : > { %v1367_v38 = vmax.f32 %v1335_v35, 0.0  ;;  %v910_v40 = vadd.f32 %v2795_v59, %v909_v37  ;;  %v998_v2 = vpop.f32.mrf.mxu3  ;;  %1237 = vadd.xlane.f32.xlu2 %v1190_v36  ;;  %v2989_v37 = vld [vmem:[%s3583_s6] ss:$0 sm:$0xff] }
 0x1c6   : > { %v1075_v60 = vpop.xlane.xlu0 %1074 }
 0x1c7   : > { %v1431_v22 = vadd.f32 1e-05, %v1367_v38  ;;  %v999_v44 = vadd.f32 %v998_v2, %v910_v40  ;;  %v2951_v46 = vmul.f32 %v2931_v47, %v1075_v60 }
 0x1c9   : > { %2257 = vrsqrt.f32 %v1431_v22  ;;  %v2948_v45 = vadd.f32 %v999_v44, %v2722_v24  ;;  %v1304_v24 = vmul.f32 %v2951_v46, %v2951_v46  ;;  %vm1469_vm2 = vweird.f32 %v1431_v22 }
 0x1cb   : > { %1104 = vadd.xlane.f32.xlu1 %v2948_v45  ;;  %v1191_v49 = vmul.f32 %v2948_v45, %v2948_v45 }
 0x1cc   : > { %v911_v50 = vpop.f32.mrf.mxu2 }
 0x1cd   : > { %v912_v51 = vadd.f32 %v2795_v59, %v911_v50  ;;  %v1000_v56 = vpop.f32.mrf.mxu3  ;;  %1239 = vadd.xlane.f32.xlu0 %v1191_v49 }
 0x1ce   : > { %v1077_v62 = vpop.xlane.xlu1 %1076  ;;  %v1210_v63 = vpop.xlane.xlu0 %1209 }
 0x1cf   : > { %v2258_v10 = vpop.eup %2257  ;;  %v1001_v0 = vadd.f32 %v1000_v56, %v912_v51  ;;  %v1272_v3 = vmul.f32 %v1210_v63, %v2931_v47  ;;  %v2964_v9 = vmul.f32 %v2931_v47, %v1077_v62 }
 0x1d0   : > { %v1464_v4 = vmul.f32 %v2258_v10, %v1431_v22  ;;  %vm1470_vm1 = vweird.f32 %v2258_v10 }
 0x1d1   : > { %v2961_v6 = vadd.f32 %v1001_v0, %v2725_v25  ;;  %v1336_v30 = vsub.f32 %v1272_v3, %v1304_v24  ;;  %v1305_v1 = vmul.f32 %v2964_v9, %v2964_v9  ;;  %vm1471_vm3 = vmor %vm1469_vm2, %vm1470_vm1 }
 0x1d2   : > { %v1465_v8 = vmul.f32 %v2258_v10, %v1464_v4 }
 0x1d3   : > { %v1368_v31 = vmax.f32 %v1336_v30, 0.0  ;;  %1106 = vadd.xlane.f32.xlu2 %v2961_v6  ;;  %v1192_v12 = vmul.f32 %v2961_v6, %v2961_v6 }
 0x1d4   : > { %v1466_v13 = vmul.f32 0.5, %v1465_v8  ;;  %v914_v14 = vpop.f32.mrf.mxu2 }
 0x1d5   : > { %v2969_v15 = vadd.f32 1e-05, %v1368_v31  ;;  %v915_v16 = vadd.f32 %v2795_v59, %v914_v14  ;;  %v1003_v18 = vpop.f32.mrf.mxu3  ;;  %1241 = vadd.xlane.f32.xlu1 %v1192_v12 }
 0x1d6   : > { %v1467_v25 = vsub.f32 1.5, %v1466_v13  ;;  %v1212_v11 = vpop.xlane.xlu1 %1211 }
 0x1d7   : > { %2259 = vrsqrt.f32 %v2969_v15  ;;  %v1004_v20 = vadd.f32 %v1003_v18, %v915_v16  ;;  %v1273_v23 = vmul.f32 %v1212_v11, %v2931_v47  ;;  %vm1479_vm5 = vweird.f32 %v2969_v15 }
 0x1d8   : > { %v1468_v26 = vmul.f32 %v2258_v10, %v1467_v25  ;;  %v1214_v27 = vpop.xlane.xlu2 %1213 }
 0x1d9   : > { %v2984_v34 = vadd.f32 %v1004_v20, %v2741_v42  ;;  %v1337_v35 = vsub.f32 %v1273_v23, %v1305_v1  ;;  %v1274_v8 = vmul.f32 %v1214_v27, %v2931_v47 }
 0x1da   : > { %v1472_v36 = vsel %vm1471_vm3, %v2258_v10, %v1468_v26 }
 0x1db   : > { %v1783_v38 = vmul.f32 %v1472_v36, %v1399_v21  ;;  %v1369_v40 = vmax.f32 %v1337_v35, 0.0  ;;  %1108 = vadd.xlane.f32.xlu0 %v2984_v34  ;;  %v1193_v7 = vmul.f32 %v2984_v34, %v2984_v34  ;;  %v1400_v21 = vsub.f32 %v2810_v29, %v2951_v46 }
 0x1dc   : > { %v916_v32 = vpop.f32.mrf.mxu2 }
 0x1dd   : > { %v2260_v2 = vpop.eup %2259  ;;  %v1818_v42 = vmul.f32 %v2981_v54, %v1783_v38  ;;  %v2997_v60 = vadd.f32 1e-05, %v1369_v40  ;;  %v917_v22 = vadd.f32 %v2795_v59, %v916_v32  ;;  %v1005_v44 = vpop.f32.mrf.mxu3  ;;  %1243 = vadd.xlane.f32.xlu2 %v1193_v7 }
 0x1de   : > { %v1474_v49 = vmul.f32 %v2260_v2, %v2969_v15  ;;  %v1079_v50 = vpop.xlane.xlu1 %1078  ;;  %vm1480_vm4 = vweird.f32 %v2260_v2 }
 0x1df   : > { %v1853_v51 = vadd.f32 %v2989_v37, %v1818_v42  ;;  %2261 = vrsqrt.f32 %v2997_v60  ;;  %v1006_v56 = vadd.f32 %v1005_v44, %v917_v22  ;;  %v3004_v63 = vmul.f32 %v2931_v47, %v1079_v50  ;;  %vm1481_vm6 = vmor %vm1479_vm5, %vm1480_vm4  ;;  %v2321_v44 = vld [vmem:[%s2601_s8 + $0xa0] sm:$0xff] }
 0x1e0   : > { %v1475_v62 = vmul.f32 %v2260_v2, %v1474_v49  ;;  %v1216_v10 = vpop.xlane.xlu0 %1215  ;;  %v1081_v24 = vpop.xlane.xlu2 %1080  ;;  %vm1489_vm8 = vweird.f32 %v2997_v60 }
 0x1e1   : > { %v1885_v0 = vmax.f32 %v1853_v51, 0.0  ;;  %v3007_v3 = vadd.f32 %v1006_v56, %v2744_v43  ;;  %v3010_v4 = vmul.f32 %v2931_v47, %v1081_v24  ;;  %v1306_v31 = vmul.f32 %v3004_v63, %v3004_v63 }
 0x1e2   : > { %v1476_v30 = vmul.f32 0.5, %v1475_v62  ;;  %v1275_v12 = vmul.f32 %v1216_v10, %v2931_v47 }
 0x1e3   : > { %1917 = vst [vmem:[%s3015_s23] sm:$0xff] %v1885_v0  ;;  %v1307_v13 = vmul.f32 %v3010_v4, %v3010_v4  ;;  %1110 = vadd.xlane.f32.xlu1 %v3007_v3  ;;  %v1194_v43 = vmul.f32 %v3007_v3, %v3007_v3  ;;  %v1338_v16 = vsub.f32 %v1274_v8, %v1306_v31 }
 0x1e4   : > { %v1477_v14 = vsub.f32 1.5, %v1476_v30  ;;  %v919_v18 = vpop.f32.mrf.mxu2 }
 0x1e5   : > { %v2262_v25 = vpop.eup %2261  ;;  %v1339_v11 = vsub.f32 %v1275_v12, %v1307_v13  ;;  %v920_v1 = vadd.f32 %v2795_v59, %v919_v18  ;;  %v1008_v20 = vpop.f32.mrf.mxu3  ;;  %1245 = vadd.xlane.f32.xlu0 %v1194_v43  ;;  %v1370_v27 = vmax.f32 %v1338_v16, 0.0  ;;  %v1401_v13 = vsub.f32 %v2816_v39, %v2964_v9 }
 0x1e6   : > { %v1478_v23 = vmul.f32 %v2260_v2, %v1477_v14  ;;  %v1484_v26 = vmul.f32 %v2262_v25, %v2997_v60  ;;  %vm1490_vm7 = vweird.f32 %v2262_v25 }
 0x1e7   : > { %v1371_v35 = vmax.f32 %v1339_v11, 0.0  ;;  %v1009_v36 = vadd.f32 %v1008_v20, %v920_v1  ;;  %v3029_v7 = vadd.f32 1e-05, %v1370_v27  ;;  %vm1491_vm9 = vmor %vm1489_vm8, %vm1490_vm7  ;;  %v2322_v27 = vld [vmem:[%s2601_s8 + $0xa8] sm:$0xff] }
 0x1e8   : > { %v1482_v38 = vsel %vm1481_vm6, %v2260_v2, %v1478_v23  ;;  %v1485_v40 = vmul.f32 %v2262_v25, %v1484_v26  ;;  %v1083_v32 = vpop.xlane.xlu2 %1082  ;;  %v1218_v15 = vpop.xlane.xlu1 %1217 }
 0x1e9   : > { %v1784_v42 = vmul.f32 %v1482_v38, %v1400_v21  ;;  %v3031_v22 = vadd.f32 1e-05, %v1371_v35  ;;  %v3034_v49 = vadd.f32 %v2321_v44, %v1009_v36  ;;  %2263 = vrsqrt.f32 %v3029_v7 }
 0x1ea   : > { %v1486_v50 = vmul.f32 0.5, %v1485_v40  ;;  %v3038_v29 = vmul.f32 %v2931_v47, %v1083_v32  ;;  %v1276_v56 = vmul.f32 %v1218_v15, %v2931_v47  ;;  %vm1499_vm11 = vweird.f32 %v3029_v7 }
 0x1eb   : > { %v1819_v46 = vmul.f32 %v2981_v54, %v1784_v42  ;;  %2265 = vrsqrt.f32 %v3031_v22  ;;  %1112 = vadd.xlane.f32.xlu2 %v3034_v49  ;;  %v1195_v2 = vmul.f32 %v3034_v49, %v3034_v49  ;;  %vm1509_vm14 = vweird.f32 %v3031_v22 }
 0x1ec   : > { %v1487_v51 = vsub.f32 1.5, %v1486_v50  ;;  %v1308_v62 = vmul.f32 %v3038_v29, %v3038_v29  ;;  %v921_v10 = vpop.f32.mrf.mxu2 }
 0x1ed   : > { %v1854_v24 = vadd.f32 %v2989_v37, %v1819_v46  ;;  %v922_v0 = vadd.f32 %v2795_v59, %v921_v10  ;;  %v1010_v30 = vpop.f32.mrf.mxu3  ;;  %1247 = vadd.xlane.f32.xlu1 %v1195_v2 }
 0x1ee   : > { %v1488_v8 = vmul.f32 %v2262_v25, %v1487_v51  ;;  %v1340_v31 = vsub.f32 %v1276_v56, %v1308_v62  ;;  %v1085_v12 = vpop.xlane.xlu0 %1084 }
 0x1ef   : > { %v1886_v43 = vmax.f32 %v1854_v24, 0.0  ;;  %v1011_v14 = vadd.f32 %v1010_v30, %v922_v0  ;;  %v3054_v16 = vmul.f32 %v2931_v47, %v1085_v12  ;;  %v2264_v18 = vpop.eup %2263 }
 0x1f0   : > { %v1492_v11 = vsel %vm1491_vm9, %v2262_v25, %v1488_v8  ;;  %v1372_v1 = vmax.f32 %v1340_v31, 0.0  ;;  %v1220_v20 = vpop.xlane.xlu2 %1219  ;;  %v1494_v60 = vmul.f32 %v2264_v18, %v3029_v7  ;;  %vm1500_vm10 = vweird.f32 %v2264_v18 }
 0x1f1   : > { %v2266_v23 = vpop.eup %2265  ;;  %1918 = vst [vmem:[%s3015_s23 + $0x8] sm:$0xff] %v1886_v43  ;;  %v1785_v26 = vmul.f32 %v1492_v11, %v1401_v13  ;;  %v3059_v21 = vadd.f32 %v2322_v27, %v1011_v14  ;;  %v1309_v35 = vmul.f32 %v3054_v16, %v3054_v16  ;;  %v1277_v38 = vmul.f32 %v1220_v20, %v2931_v47  ;;  %v2323_v43 = vld [vmem:[%s2601_s8 + $0xb0] sm:$0xff]  ;;  %vm1501_vm13 = vmor %vm1499_vm11, %vm1500_vm10 }
 0x1f2   : > { %v1504_v39 = vmul.f32 %v2266_v23, %v3031_v22  ;;  %v3062_v9 = vadd.f32 1e-05, %v1372_v1  ;;  %v1495_v25 = vmul.f32 %v2264_v18, %v1494_v60  ;;  %vm1510_vm12 = vweird.f32 %v2266_v23 }
 0x1f3   : > { %v1820_v36 = vmul.f32 %v2981_v54, %v1785_v26  ;;  %1114 = vadd.xlane.f32.xlu0 %v3059_v21  ;;  %v1196_v42 = vmul.f32 %v3059_v21, %v3059_v21  ;;  %v1341_v50 = vsub.f32 %v1277_v38, %v1309_v35  ;;  %v1402_v20 = vsub.f32 %v2826_v5, %v3004_v63  ;;  %vm1511_vm15 = vmor %vm1509_vm14, %vm1510_vm12 }
 0x1f4   : > { %v1505_v40 = vmul.f32 %v2266_v23, %v1504_v39  ;;  %2267 = vrsqrt.f32 %v3062_v9  ;;  %v924_v32 = vpop.f32.mrf.mxu2  ;;  %v1496_v15 = vmul.f32 0.5, %v1495_v25  ;;  %v1403_v27 = vsub.f32 %v2836_v17, %v3010_v4 }
 0x1f5   : > { %v1855_v44 = vadd.f32 %v2989_v37, %v1820_v36  ;;  %v925_v46 = vadd.f32 %v2795_v59, %v924_v32  ;;  %v1013_v2 = vpop.f32.mrf.mxu3  ;;  %1249 = vadd.xlane.f32.xlu2 %v1196_v42  ;;  %v1373_v24 = vmax.f32 %v1341_v50, 0.0  ;;  %vm1519_vm1 = vweird.f32 %v3062_v9 }
 0x1f6   : > { %v1506_v51 = vmul.f32 0.5, %v1505_v40  ;;  %v1087_v56 = vpop.xlane.xlu1 %1086  ;;  %v1497_v10 = vsub.f32 1.5, %v1496_v15 }
 0x1f7   : > { %v1887_v62 = vmax.f32 %v1855_v44, 0.0  ;;  %v1014_v0 = vadd.f32 %v1013_v2, %v925_v46  ;;  %v3076_v8 = vmul.f32 %v2931_v47, %v1087_v56  ;;  %v3079_v13 = vadd.f32 1e-05, %v1373_v24 }
 0x1f8   : > { %v1507_v30 = vsub.f32 1.5, %v1506_v51  ;;  %v1222_v31 = vpop.xlane.xlu0 %1221  ;;  %v1498_v12 = vmul.f32 %v2264_v18, %v1497_v10 }
 0x1f9   : > { %1919 = vst [vmem:[%s3015_s23 + $0x10] sm:$0xff] %v1887_v62  ;;  %v3082_v14 = vadd.f32 %v2323_v43, %v1014_v0  ;;  %v1278_v11 = vmul.f32 %v1222_v31, %v2931_v47  ;;  %v1310_v26 = vmul.f32 %v3076_v8, %v3076_v8  ;;  %2269 = vrsqrt.f32 %v3079_v13  ;;  %v2324_v62 = vld [vmem:[%s2601_s8 + $0xb8] sm:$0xff] }
 0x1fa   : > { %v2268_v1 = vpop.eup %2267  ;;  %v1508_v7 = vmul.f32 %v2266_v23, %v1507_v30  ;;  %v1502_v60 = vsel %vm1501_vm13, %v2264_v18, %v1498_v12  ;;  %vm1529_vm4 = vweird.f32 %v3079_v13 }
 0x1fb   : > { %v1514_v39 = vmul.f32 %v2268_v1, %v3062_v9  ;;  %1116 = vadd.xlane.f32.xlu1 %v3082_v14  ;;  %v1786_v5 = vmul.f32 %v1502_v60, %v1402_v20  ;;  %v1342_v35 = vsub.f32 %v1278_v11, %v1310_v26  ;;  %v1197_v17 = vmul.f32 %v3082_v14, %v3082_v14 }
 0x1fc   : > { %v1512_v63 = vsel %vm1511_vm15, %v2266_v23, %v1508_v7  ;;  %v926_v36 = vpop.f32.mrf.mxu2  ;;  %vm1520_vm0 = vweird.f32 %v2268_v1  ;;  %v1404_v11 = vsub.f32 %v2847_v48, %v3038_v29 }
 0x1fd   : > { %v1787_v22 = vmul.f32 %v1512_v63, %v1403_v27  ;;  %v1515_v25 = vmul.f32 %v2268_v1, %v1514_v39  ;;  %v927_v38 = vadd.f32 %v2795_v59, %v926_v36  ;;  %v1015_v18 = vpop.f32.mrf.mxu3  ;;  %v1821_v4 = vmul.f32 %v2981_v54, %v1786_v5  ;;  %1251 = vadd.xlane.f32.xlu0 %v1197_v17  ;;  %vm1521_vm2 = vmor %vm1519_vm1, %vm1520_vm0  ;;  %v2325_v17 = vld [vmem:[%s2601_s8 + $0xc0] sm:$0xff] }
 0x1fe   : > { %v1374_v40 = vmax.f32 %v1342_v35, 0.0  ;;  %v1089_v32 = vpop.xlane.xlu2 %1088 }
 0x1ff   : > { %v1822_v42 = vmul.f32 %v2981_v54, %v1787_v22  ;;  %v1516_v44 = vmul.f32 0.5, %v1515_v25  ;;  %v1016_v15 = vadd.f32 %v1015_v18, %v927_v38  ;;  %v3103_v23 = vmul.f32 %v2931_v47, %v1089_v32  ;;  %v2270_v2 = vpop.eup %2269 }
 0x200   : > { %v1856_v50 = vadd.f32 %v2989_v37, %v1821_v4  ;;  %v3106_v46 = vadd.f32 1e-05, %v1374_v40  ;;  %v1224_v24 = vpop.xlane.xlu1 %1223  ;;  %v1524_v30 = vmul.f32 %v2270_v2, %v3079_v13  ;;  %vm1530_vm3 = vweird.f32 %v2270_v2 }
 0x201   : > { %v1857_v51 = vadd.f32 %v2989_v37, %v1822_v42  ;;  %v1517_v56 = vsub.f32 1.5, %v1516_v44  ;;  %v3110_v10 = vadd.f32 %v2324_v62, %v1016_v15  ;;  %v1311_v31 = vmul.f32 %v3103_v23, %v3103_v23  ;;  %vm1531_vm5 = vmor %vm1529_vm4, %vm1530_vm3 }
 0x202   : > { %v1888_v0 = vmax.f32 %v1856_v50, 0.0  ;;  %2271 = vrsqrt.f32 %v3106_v46  ;;  %v1525_v20 = vmul.f32 %v2270_v2, %v1524_v30  ;;  %v1279_v7 = vmul.f32 %v1224_v24, %v2931_v47 }
 0x203   : > { %v1889_v12 = vmax.f32 %v1857_v51, 0.0  ;;  %v1518_v43 = vmul.f32 %v2268_v1, %v1517_v56  ;;  %1118 = vadd.xlane.f32.xlu2 %v3110_v10  ;;  %v1198_v60 = vmul.f32 %v3110_v10, %v3110_v10  ;;  %v1405_v15 = vsub.f32 %v2855_v55, %v3054_v16  ;;  %v3150_v55 = vld [vmem:[%s3581_s4] ss:$0 sm:$0xff] }
 0x204   : > { %1920 = vst [vmem:[%s3015_s23 + $0x18] sm:$0xff] %v1888_v0  ;;  %v929_v26 = vpop.f32.mrf.mxu2  ;;  %v1526_v63 = vmul.f32 0.5, %v1525_v20  ;;  %v1343_v35 = vsub.f32 %v1279_v7, %v1311_v31  ;;  %vm1539_vm7 = vweird.f32 %v3106_v46 }
 0x205   : > { %1921 = vst [vmem:[%s3015_s23 + $0x20] sm:$0xff] %v1889_v12  ;;  %v1522_v27 = vsel %vm1521_vm2, %v2268_v1, %v1518_v43  ;;  %v930_v39 = vadd.f32 %v2795_v59, %v929_v26  ;;  %v1018_v9 = vpop.f32.mrf.mxu3  ;;  %1253 = vadd.xlane.f32.xlu1 %v1198_v60 }
 0x206   : > { %v1788_v5 = vmul.f32 %v1522_v27, %v1404_v11  ;;  %v1091_v36 = vpop.xlane.xlu0 %1090  ;;  %v1527_v38 = vsub.f32 1.5, %v1526_v63  ;;  %v1375_v18 = vmax.f32 %v1343_v35, 0.0 }
 0x207   : > { %v1019_v48 = vadd.f32 %v1018_v9, %v930_v39  ;;  %v3127_v29 = vmul.f32 %v2931_v47, %v1091_v36  ;;  %v1406_v36 = vsub.f32 %v2865_v52, %v3076_v8 }
 0x208   : > { %v2272_v22 = vpop.eup %2271  ;;  %v1823_v25 = vmul.f32 %v2981_v54, %v1788_v5  ;;  %v1226_v1 = vpop.xlane.xlu2 %1225  ;;  %v1528_v42 = vmul.f32 %v2270_v2, %v1527_v38  ;;  %v3138_v44 = vadd.f32 1e-05, %v1375_v18  ;;  %v2327_v5 = vld [vmem:[%s2601_s8 + $0xc8] sm:$0xff] }
 0x209   : > { %v1534_v59 = vmul.f32 %v2272_v22, %v3106_v46  ;;  %v3132_v4 = vadd.f32 %v2325_v17, %v1019_v48  ;;  %v1312_v40 = vmul.f32 %v3127_v29, %v3127_v29  ;;  %v1280_v51 = vmul.f32 %v1226_v1, %v2931_v47 }
 0x20a   : > { %v1858_v32 = vadd.f32 %v2989_v37, %v1823_v25  ;;  %v1532_v24 = vsel %vm1531_vm5, %v2270_v2, %v1528_v42  ;;  %2273 = vrsqrt.f32 %v3138_v44  ;;  %vm1540_vm6 = vweird.f32 %v2272_v22 }
 0x20b   : > { %v1535_v50 = vmul.f32 %v2272_v22, %v1534_v59  ;;  %1120 = vadd.xlane.f32.xlu0 %v3132_v4  ;;  %v1199_v56 = vmul.f32 %v3132_v4, %v3132_v4  ;;  %v1789_v0 = vmul.f32 %v1532_v24, %v1405_v15  ;;  %v1344_v31 = vsub.f32 %v1280_v51, %v1312_v40  ;;  %vm1541_vm8 = vmor %vm1539_vm7, %vm1540_vm6 }
 0x20c   : > { %v1890_v62 = vmax.f32 %v1858_v32, 0.0  ;;  %v931_v13 = vpop.f32.mrf.mxu2  ;;  %vm1549_vm10 = vweird.f32 %v3138_v44 }
 0x20d   : > { %v1536_v30 = vmul.f32 0.5, %v1535_v50  ;;  %v932_v16 = vadd.f32 %v3150_v55, %v931_v13  ;;  %v1020_v12 = vpop.f32.mrf.mxu3  ;;  %1255 = vadd.xlane.f32.xlu2 %v1199_v56  ;;  %v1824_v2 = vmul.f32 %v2981_v54, %v1789_v0  ;;  %v1376_v20 = vmax.f32 %v1344_v31, 0.0 }
 0x20e   : > { %1922 = vst [vmem:[%s3015_s23 + $0x28] sm:$0xff] %v1890_v62  ;;  %v1093_v43 = vpop.xlane.xlu1 %1092 }
 0x20f   : > { %v1537_v11 = vsub.f32 1.5, %v1536_v30  ;;  %v1021_v7 = vadd.f32 %v1020_v12, %v932_v16  ;;  %v3157_v26 = vmul.f32 %v2931_v47, %v1093_v43  ;;  %v1859_v27 = vadd.f32 %v2989_v37, %v1824_v2  ;;  %v2328_v30 = vld [vmem:[%s2601_s8 + $0xd0] sm:$0xff] }
 0x210   : > { %v1228_v60 = vpop.xlane.xlu0 %1227  ;;  %v3160_v9 = vadd.f32 1e-05, %v1376_v20  ;;  %v2274_v35 = vpop.eup %2273 }
 0x211   : > { %v1538_v39 = vmul.f32 %v2272_v22, %v1537_v11  ;;  %v3163_v63 = vadd.f32 %v2327_v5, %v1021_v7  ;;  %v1313_v46 = vmul.f32 %v3157_v26, %v3157_v26  ;;  %v1281_v48 = vmul.f32 %v1228_v60, %v2931_v47 }
 0x212   : > { %v1891_v25 = vmax.f32 %v1859_v27, 0.0  ;;  %v1544_v18 = vmul.f32 %v2274_v35, %v3138_v44  ;;  %2275 = vrsqrt.f32 %v3160_v9  ;;  %vm1550_vm9 = vweird.f32 %v2274_v35 }
 0x213   : > { %v1542_v38 = vsel %vm1541_vm8, %v2272_v22, %v1538_v39  ;;  %1122 = vadd.xlane.f32.xlu1 %v3163_v63  ;;  %v1345_v59 = vsub.f32 %v1281_v48, %v1313_v46  ;;  %v1200_v32 = vmul.f32 %v3163_v63, %v3163_v63  ;;  %v1407_v60 = vsub.f32 %v2873_v58, %v3103_v23  ;;  %vm1551_vm11 = vmor %vm1549_vm10, %vm1550_vm9 }
 0x214   : > { %v1790_v1 = vmul.f32 %v1542_v38, %v1406_v36  ;;  %v934_v17 = vpop.f32.mrf.mxu2  ;;  %1923 = vst [vmem:[%s3015_s23 + $0x30] sm:$0xff] %v1891_v25  ;;  %v1545_v52 = vmul.f32 %v2274_v35, %v1544_v18  ;;  %vm1559_vm13 = vweird.f32 %v3160_v9 }
 0x215   : > { %v935_v8 = vadd.f32 %v3150_v55, %v934_v17  ;;  %v1023_v40 = vpop.f32.mrf.mxu3  ;;  %v1377_v42 = vmax.f32 %v1345_v59, 0.0  ;;  %1257 = vadd.xlane.f32.xlu0 %v1200_v32 }
 0x216   : > { %v1825_v22 = vmul.f32 %v2981_v54, %v1790_v1  ;;  %v1095_v15 = vpop.xlane.xlu2 %1094  ;;  %v1546_v50 = vmul.f32 0.5, %v1545_v52 }
 0x217   : > { %v1024_v51 = vadd.f32 %v1023_v40, %v935_v8  ;;  %v3180_v56 = vmul.f32 %v2931_v47, %v1095_v15  ;;  %v3183_v24 = vadd.f32 1e-05, %v1377_v42  ;;  %v2329_v40 = vld [vmem:[%s2601_s8 + $0xd8] sm:$0xff] }
 0x218   : > { %v1860_v62 = vadd.f32 %v2989_v37, %v1825_v22  ;;  %v1230_v13 = vpop.xlane.xlu1 %1229  ;;  %v1547_v0 = vsub.f32 1.5, %v1546_v50  ;;  %v2276_v12 = vpop.eup %2275 }
 0x219   : > { %v3186_v31 = vadd.f32 %v2328_v30, %v1024_v51  ;;  %v1314_v16 = vmul.f32 %v3180_v56, %v3180_v56  ;;  %2277 = vrsqrt.f32 %v3183_v24  ;;  %v1282_v2 = vmul.f32 %v1230_v13, %v2931_v47 }
 0x21a   : > { %v1892_v43 = vmax.f32 %v1860_v62, 0.0  ;;  %v1548_v11 = vmul.f32 %v2274_v35, %v1547_v0  ;;  %v1554_v20 = vmul.f32 %v2276_v12, %v3160_v9  ;;  %vm1560_vm12 = vweird.f32 %v2276_v12 }
 0x21b   : > { %1124 = vadd.xlane.f32.xlu2 %v3186_v31  ;;  %v1201_v7 = vmul.f32 %v3186_v31, %v3186_v31  ;;  %v1346_v27 = vsub.f32 %v1282_v2, %v1314_v16  ;;  %v1408_v13 = vsub.f32 %v2883_v53, %v3127_v29  ;;  %vm1561_vm14 = vmor %vm1559_vm13, %vm1560_vm12  ;;  %vm1569_vm0 = vweird.f32 %v3183_v24 }
 0x21c   : > { %1924 = vst [vmem:[%s3015_s23 + $0x38] sm:$0xff] %v1892_v43  ;;  %v936_v39 = vpop.f32.mrf.mxu2  ;;  %v1552_v5 = vsel %vm1551_vm11, %v2274_v35, %v1548_v11  ;;  %v1555_v36 = vmul.f32 %v2276_v12, %v1554_v20 }
 0x21d   : > { %v937_v46 = vadd.f32 %v3150_v55, %v936_v39  ;;  %v1025_v44 = vpop.f32.mrf.mxu3  ;;  %1259 = vadd.xlane.f32.xlu1 %v1201_v7  ;;  %v1791_v48 = vmul.f32 %v1552_v5, %v1407_v60  ;;  %v1378_v25 = vmax.f32 %v1346_v27, 0.0 }
 0x21e   : > { %v1097_v38 = vpop.xlane.xlu0 %1096  ;;  %v1556_v18 = vmul.f32 0.5, %v1555_v36 }
 0x21f   : > { %v1026_v1 = vadd.f32 %v1025_v44, %v937_v46  ;;  %v3203_v59 = vmul.f32 %v2931_v47, %v1097_v38  ;;  %v2278_v58 = vpop.eup %2277  ;;  %v1826_v23 = vmul.f32 %v2981_v54, %v1791_v48  ;;  %v3206_v17 = vadd.f32 1e-05, %v1378_v25  ;;  %v2330_v38 = vld [vmem:[%s2601_s8 + $0xe0] sm:$0xff] }
 0x220   : > { %v1232_v35 = vpop.xlane.xlu2 %1231  ;;  %v1557_v52 = vsub.f32 1.5, %v1556_v18  ;;  %v1564_v8 = vmul.f32 %v2278_v58, %v3183_v24  ;;  %vm1570_vm15 = vweird.f32 %v2278_v58  ;;  %v1409_v25 = vsub.f32 %v2891_v61, %v3157_v26 }
 0x221   : > { %v3210_v32 = vadd.f32 %v2329_v40, %v1026_v1  ;;  %v1861_v22 = vadd.f32 %v2989_v37, %v1826_v23  ;;  %2279 = vrsqrt.f32 %v3206_v17  ;;  %v1315_v42 = vmul.f32 %v3203_v59, %v3203_v59  ;;  %vm1571_vm1 = vmor %vm1569_vm0, %vm1570_vm15 }
 0x222   : > { %v1558_v15 = vmul.f32 %v2276_v12, %v1557_v52  ;;  %v1565_v50 = vmul.f32 %v2278_v58, %v1564_v8  ;;  %v1283_v51 = vmul.f32 %v1232_v35, %v2931_v47  ;;  %vm1579_vm3 = vweird.f32 %v3206_v17 }
 0x223   : > { %1126 = vadd.xlane.f32.xlu0 %v3210_v32  ;;  %v1893_v62 = vmax.f32 %v1861_v22, 0.0  ;;  %v1202_v30 = vmul.f32 %v3210_v32, %v3210_v32 }
 0x224   : > { %v939_v0 = vpop.f32.mrf.mxu2  ;;  %v1562_v16 = vsel %vm1561_vm14, %v2276_v12, %v1558_v15  ;;  %v1566_v43 = vmul.f32 0.5, %v1565_v50  ;;  %v1347_v2 = vsub.f32 %v1283_v51, %v1315_v42 }
 0x225   : > { %v940_v11 = vadd.f32 %v3150_v55, %v939_v0  ;;  %v1028_v9 = vpop.f32.mrf.mxu3  ;;  %1925 = vst [vmem:[%s3015_s23 + $0x40] sm:$0xff] %v1893_v62  ;;  %v1792_v20 = vmul.f32 %v1562_v16, %v1408_v13  ;;  %1261 = vadd.xlane.f32.xlu2 %v1202_v30 }
 0x226   : > { %v1099_v7 = vpop.xlane.xlu1 %1098  ;;  %v1567_v60 = vsub.f32 1.5, %v1566_v43  ;;  %v1379_v27 = vmax.f32 %v1347_v2, 0.0 }
 0x227   : > { %v1029_v53 = vadd.f32 %v1028_v9, %v940_v11  ;;  %v3226_v29 = vmul.f32 %v2931_v47, %v1099_v7  ;;  %v2280_v39 = vpop.eup %2279  ;;  %v1827_v12 = vmul.f32 %v2981_v54, %v1792_v20  ;;  %v2331_v11 = vld [vmem:[%s2601_s8 + $0xe8] sm:$0xff] }
 0x228   : > { %v1568_v5 = vmul.f32 %v2278_v58, %v1567_v60  ;;  %v1574_v36 = vmul.f32 %v2280_v39, %v3206_v17  ;;  %v3231_v46 = vadd.f32 1e-05, %v1379_v27  ;;  %v1234_v44 = vpop.xlane.xlu0 %1233  ;;  %vm1580_vm2 = vweird.f32 %v2280_v39 }
 0x229   : > { %v1862_v48 = vadd.f32 %v2989_v37, %v1827_v12  ;;  %v3238_v18 = vadd.f32 %v2330_v38, %v1029_v53  ;;  %v1316_v1 = vmul.f32 %v3226_v29, %v3226_v29  ;;  %v1284_v8 = vmul.f32 %v1234_v44, %v2931_v47  ;;  %vm1581_vm4 = vmor %vm1579_vm3, %vm1580_vm2 }
 0x22a   : > { %v1572_v24 = vsel %vm1571_vm1, %v2278_v58, %v1568_v5  ;;  %v1575_v23 = vmul.f32 %v2280_v39, %v1574_v36  ;;  %2281 = vrsqrt.f32 %v3231_v46  ;;  %v1410_v60 = vsub.f32 %v2901_v28, %v3180_v56 }
 0x22b   : > { %v1894_v35 = vmax.f32 %v1862_v48, 0.0  ;;  %v1793_v52 = vmul.f32 %v1572_v24, %v1409_v25  ;;  %1128 = vadd.xlane.f32.xlu1 %v3238_v18  ;;  %v1203_v26 = vmul.f32 %v3238_v18, %v3238_v18  ;;  %v1348_v15 = vsub.f32 %v1284_v8, %v1316_v1 }
 0x22c   : > { %v941_v61 = vpop.f32.mrf.mxu2  ;;  %v1576_v40 = vmul.f32 0.5, %v1575_v23  ;;  %vm1589_vm6 = vweird.f32 %v3231_v46 }
 0x22d   : > { %v942_v22 = vadd.f32 %v3150_v55, %v941_v61  ;;  %v1030_v42 = vpop.f32.mrf.mxu3  ;;  %1926 = vst [vmem:[%s3015_s23 + $0x48] sm:$0xff] %v1894_v35  ;;  %v1828_v58 = vmul.f32 %v2981_v54, %v1793_v52  ;;  %1263 = vadd.xlane.f32.xlu0 %v1203_v26  ;;  %v1380_v30 = vmax.f32 %v1348_v15, 0.0  ;;  %v2332_v26 = vld [vmem:[%s2601_s8 + $0xf0] sm:$0xff] }
 0x22e   : > { %v1101_v50 = vpop.xlane.xlu2 %1100  ;;  %v1577_v51 = vsub.f32 1.5, %v1576_v40 }
 0x22f   : > { %v1031_v62 = vadd.f32 %v1030_v42, %v942_v22  ;;  %v3251_v13 = vmul.f32 %v2931_v47, %v1101_v50  ;;  %v1863_v0 = vadd.f32 %v2989_v37, %v1828_v58  ;;  %v3263_v53 = vadd.f32 1e-05, %v1380_v30 }
 0x230   : > { %v1236_v16 = vpop.xlane.xlu1 %1235  ;;  %v2282_v43 = vpop.eup %2281  ;;  %v1578_v2 = vmul.f32 %v2280_v39, %v1577_v51  ;;  %v1411_v51 = vsub.f32 %v2909_v41, %v3203_v59 }
 0x231   : > { %v3256_v9 = vadd.f32 %v2331_v11, %v1031_v62  ;;  %v1317_v20 = vmul.f32 %v3251_v13, %v3251_v13  ;;  %v1895_v7 = vmax.f32 %v1863_v0, 0.0  ;;  %v1584_v27 = vmul.f32 %v2282_v43, %v3231_v46 }
 0x232   : > { %v1582_v12 = vsel %vm1581_vm4, %v2280_v39, %v1578_v2  ;;  %v1285_v5 = vmul.f32 %v1236_v16, %v2931_v47  ;;  %2283 = vrsqrt.f32 %v3263_v53  ;;  %vm1590_vm5 = vweird.f32 %v2282_v43 }
 0x233   : > { %1130 = vadd.xlane.f32.xlu2 %v3256_v9  ;;  %1927 = vst [vmem:[%s3015_s23 + $0x50] sm:$0xff] %v1895_v7  ;;  %v1794_v17 = vmul.f32 %v1582_v12, %v1410_v60  ;;  %v1585_v36 = vmul.f32 %v2282_v43, %v1584_v27  ;;  %vm1591_vm7 = vmor %vm1589_vm6, %vm1590_vm5  ;;  %vm1599_vm9 = vweird.f32 %v3263_v53 }
 0x234   : > { %v944_v44 = vpop.f32.mrf.mxu2  ;;  %v1349_v48 = vsub.f32 %v1285_v5, %v1317_v20 }
 0x235   : > { %v945_v28 = vadd.f32 %v3150_v55, %v944_v44  ;;  %v1033_v56 = vpop.f32.mrf.mxu3  ;;  %v1829_v25 = vmul.f32 %v2981_v54, %v1794_v17  ;;  %v1586_v38 = vmul.f32 0.5, %v1585_v36 }
 0x236   : > { %v1103_v1 = vpop.xlane.xlu0 %1102  ;;  %v1381_v39 = vmax.f32 %v1349_v48, 0.0  ;;  %v2333_v48 = vld [vmem:[%s2601_s8 + $0xf8] sm:$0xff] }
 0x237   : > { %v1034_v24 = vadd.f32 %v1033_v56, %v945_v28  ;;  %v3272_v23 = vmul.f32 %v2931_v47, %v1103_v1  ;;  %v1864_v35 = vadd.f32 %v2989_v37, %v1829_v25  ;;  %v1587_v52 = vsub.f32 1.5, %v1586_v38 }
 0x238   : > { %v1238_v8 = vpop.xlane.xlu2 %1237  ;;  %v3275_v61 = vadd.f32 1e-05, %v1381_v39  ;;  %v2284_v42 = vpop.eup %2283 }
 0x239   : > { %v3278_v40 = vadd.f32 %v2332_v26, %v1034_v24  ;;  %v1318_v22 = vmul.f32 %v3272_v23, %v3272_v23  ;;  %v1896_v58 = vmax.f32 %v1864_v35, 0.0  ;;  %v1588_v15 = vmul.f32 %v2282_v43, %v1587_v52 }
 0x23a   : > { %v1286_v50 = vmul.f32 %v1238_v8, %v2931_v47  ;;  %v1594_v62 = vmul.f32 %v2284_v42, %v3263_v53  ;;  %2285 = vrsqrt.f32 %v3275_v61  ;;  %vm1600_vm8 = vweird.f32 %v2284_v42 }
 0x23b   : > { %1132 = vadd.xlane.f32.xlu0 %v3278_v40  ;;  %1928 = vst [vmem:[%s3015_s23 + $0x58] sm:$0xff] %v1896_v58  ;;  %v1592_v0 = vsel %vm1591_vm7, %v2282_v43, %v1588_v15  ;;  %v1205_v2 = vmul.f32 %v3278_v40, %v3278_v40  ;;  %v1412_v24 = vsub.f32 %v2919_v57, %v3226_v29  ;;  %vm1601_vm10 = vmor %vm1599_vm9, %vm1600_vm8  ;;  %vm1609_vm12 = vweird.f32 %v3275_v61 }
 0x23c   : > { %v1350_v30 = vsub.f32 %v1286_v50, %v1318_v22  ;;  %v946_v16 = vpop.f32.mrf.mxu2  ;;  %v1795_v46 = vmul.f32 %v1592_v0, %v1411_v51  ;;  %v1595_v11 = vmul.f32 %v2284_v42, %v1594_v62 }
 0x23d   : > { %v947_v20 = vadd.f32 %v3150_v55, %v946_v16  ;;  %v1035_v59 = vpop.f32.mrf.mxu3  ;;  %1267 = vadd.xlane.f32.xlu2 %v1205_v2  ;;  %v1204_v16 = vmul.f32 %v3256_v9, %v3256_v9 }
 0x23e   : > { %v1382_v41 = vmax.f32 %v1350_v30, 0.0  ;;  %v1105_v7 = vpop.xlane.xlu1 %1104  ;;  %v1830_v60 = vmul.f32 %v2981_v54, %v1795_v46  ;;  %v1596_v27 = vmul.f32 0.5, %v1595_v11 }
 0x23f   : > { %v1036_v12 = vadd.f32 %v1035_v59, %v947_v20  ;;  %v3295_v43 = vmul.f32 %v2931_v47, %v1105_v7  ;;  %v1413_v20 = vsub.f32 %v2926_v19, %v3251_v13 }
 0x240   : > { %v3297_v5 = vadd.f32 1e-05, %v1382_v41  ;;  %v1240_v17 = vpop.xlane.xlu0 %1239  ;;  %v2286_v36 = vpop.eup %2285  ;;  %v1865_v44 = vadd.f32 %v2989_v37, %v1830_v60  ;;  %v1597_v55 = vsub.f32 1.5, %v1596_v27 }
 0x241   : > { %v3301_v28 = vadd.f32 %v2333_v48, %v1036_v12  ;;  %v1319_v56 = vmul.f32 %v3295_v43, %v3295_v43  ;;  %v1604_v25 = vmul.f32 %v2286_v36, %v3275_v61  ;;  %v1287_v39 = vmul.f32 %v1240_v17, %v2931_v47 }
 0x242   : > { %2287 = vrsqrt.f32 %v3297_v5  ;;  %v1897_v38 = vmax.f32 %v1865_v44, 0.0  ;;  %v1598_v1 = vmul.f32 %v2284_v42, %v1597_v55  ;;  %vm1610_vm11 = vweird.f32 %v2286_v36 }
 0x243   : > { %1134 = vadd.xlane.f32.xlu1 %v3301_v28  ;;  %v1605_v35 = vmul.f32 %v2286_v36, %v1604_v25  ;;  %v1206_v52 = vmul.f32 %v3301_v28, %v3301_v28  ;;  %v1351_v26 = vsub.f32 %v1287_v39, %v1319_v56  ;;  %vm1611_vm13 = vmor %vm1609_vm12, %vm1610_vm11  ;;  %vm1619_vm15 = vweird.f32 %v3297_v5 }
 0x244   : > { %1929 = vst [vmem:[%s3015_s23 + $0x60] sm:$0xff] %v1897_v38  ;;  %v1602_v8 = vsel %vm1601_vm10, %v2284_v42, %v1598_v1  ;;  %v1414_v1 = vsub.f32 %v2938_v33, %v3272_v23 }
 0x245   : > { %v1796_v22 = vmul.f32 %v1602_v8, %v1412_v24  ;;  %v1606_v58 = vmul.f32 0.5, %v1605_v35  ;;  %1269 = vadd.xlane.f32.xlu0 %v1206_v52  ;;  %v1383_v15 = vmax.f32 %v1351_v26, 0.0 }
 0x246   : > { %v1107_v53 = vpop.xlane.xlu2 %1106 }
 0x247   : > { %v3317_v50 = vmul.f32 %v2931_v47, %v1107_v53  ;;  %v1831_v57 = vmul.f32 %v2981_v54, %v1796_v22  ;;  %v1607_v29 = vsub.f32 1.5, %v1606_v58  ;;  %v1447_v30 = vadd.f32 1e-05, %v1383_v15 }
 0x248   : > { %v2288_v51 = vpop.eup %2287  ;;  %v1242_v62 = vpop.xlane.xlu1 %1241 }
 0x249   : > { %v1614_v0 = vmul.f32 %v2288_v51, %v3297_v5  ;;  %v1320_v42 = vmul.f32 %v3317_v50, %v3317_v50  ;;  %v1866_v2 = vadd.f32 %v2989_v37, %v1831_v57  ;;  %v1608_v46 = vmul.f32 %v2286_v36, %v1607_v29 }
 0x24a   : > { %v1288_v11 = vmul.f32 %v1242_v62, %v2931_v47  ;;  %2289 = vrsqrt.f32 %v1447_v30  ;;  %vm1620_vm14 = vweird.f32 %v2288_v51  ;;  %vm1629_vm2 = vweird.f32 %v1447_v30 }
 0x24b   : > { %v1615_v41 = vmul.f32 %v2288_v51, %v1614_v0  ;;  %1265 = vadd.xlane.f32.xlu1 %v1204_v16  ;;  %v1898_v59 = vmax.f32 %v1866_v2, 0.0  ;;  %v1612_v7 = vsel %vm1611_vm13, %v2286_v36, %v1608_v46  ;;  %vm1621_vm0 = vmor %vm1619_vm15, %vm1620_vm14  ;;  %v1415_v46 = vsub.f32 %v2948_v45, %v3295_v43 }
 0x24c   : > { %v1352_v60 = vsub.f32 %v1288_v11, %v1320_v42  ;;  %v1797_v27 = vmul.f32 %v1612_v7, %v1413_v20 }
 0x24d   : > { %v1616_v12 = vmul.f32 0.5, %v1615_v41  ;;  %1930 = vst [vmem:[%s3015_s23 + $0x68] sm:$0xff] %v1898_v59 }
 0x24e   : > { %v1384_v17 = vmax.f32 %v1352_v60, 0.0  ;;  %v1109_v44 = vpop.xlane.xlu0 %1108  ;;  %v1832_v55 = vmul.f32 %v2981_v54, %v1797_v27  ;;  %v3357_v27 = vld [vmem:[%s3582_s5] ss:$0 sm:$0xff] }
 0x24f   : > { %v1617_v61 = vsub.f32 1.5, %v1616_v12  ;;  %v3333_v48 = vmul.f32 %v2931_v47, %v1109_v44 }
 0x250   : > { %v1448_v19 = vadd.f32 1e-05, %v1384_v17  ;;  %v1244_v13 = vpop.xlane.xlu2 %1243  ;;  %v2290_v56 = vpop.eup %2289  ;;  %v1867_v25 = vadd.f32 %v2989_v37, %v1832_v55  ;;  %v3366_v55 = vld [vmem:[%s3583_s6] ss:$0 sm:$0xff] }
 0x251   : > { %v1618_v36 = vmul.f32 %v2288_v51, %v1617_v61  ;;  %v1321_v38 = vmul.f32 %v3333_v48, %v3333_v48  ;;  %v1624_v39 = vmul.f32 %v2290_v56, %v1447_v30  ;;  %v1289_v52 = vmul.f32 %v1244_v13, %v2931_v47 }
 0x252   : > { %2291 = vrsqrt.f32 %v1448_v19  ;;  %v1899_v24 = vmax.f32 %v1867_v25, 0.0  ;;  %vm1630_vm1 = vweird.f32 %v2290_v56  ;;  %vm1639_vm5 = vweird.f32 %v1448_v19 }
 0x253   : > { %v1622_v35 = vsel %vm1621_vm0, %v2288_v51, %v1618_v36  ;;  %v1625_v26 = vmul.f32 %v2290_v56, %v1624_v39  ;;  %v1353_v22 = vsub.f32 %v1289_v52, %v1321_v38  ;;  %vm1631_vm3 = vmor %vm1629_vm2, %vm1630_vm1  ;;  %v1416_v25 = vsub.f32 %v2961_v6, %v3317_v50 }
 0x254   : > { %v1798_v8 = vmul.f32 %v1622_v35, %v1414_v1  ;;  %1931 = vst [vmem:[%s3015_s23 + $0x70] sm:$0xff] %v1899_v24 }
 0x255   : > { %v1626_v5 = vmul.f32 0.5, %v1625_v26  ;;  %v1385_v15 = vmax.f32 %v1353_v22, 0.0 }
 0x256   : > { %v1833_v58 = vmul.f32 %v2981_v54, %v1798_v8  ;;  %v1111_v53 = vpop.xlane.xlu1 %1110 }
 0x257   : > { %v3345_v57 = vmul.f32 %v2931_v47, %v1111_v53  ;;  %v1627_v29 = vsub.f32 1.5, %v1626_v5  ;;  %v1449_v0 = vadd.f32 1e-05, %v1385_v15 }
 0x258   : > { %v2292_v33 = vpop.eup %2291  ;;  %v1868_v23 = vadd.f32 %v2989_v37, %v1833_v58  ;;  %v1246_v51 = vpop.xlane.xlu0 %1245 }
 0x259   : > { %v1634_v62 = vmul.f32 %v2292_v33, %v1448_v19  ;;  %v1322_v42 = vmul.f32 %v3345_v57, %v3345_v57  ;;  %v1628_v54 = vmul.f32 %v2290_v56, %v1627_v29  ;;  %v1290_v2 = vmul.f32 %v1246_v51, %v2931_v47 }
 0x25a   : > { %v1900_v16 = vmax.f32 %v1868_v23, 0.0  ;;  %2293 = vrsqrt.f32 %v1449_v0  ;;  %vm1640_vm4 = vweird.f32 %v2292_v33  ;;  %vm1649_vm8 = vweird.f32 %v1449_v0 }
 0x25b   : > { %v1635_v11 = vmul.f32 %v2292_v33, %v1634_v62  ;;  %v1632_v37 = vsel %vm1631_vm3, %v2290_v56, %v1628_v54  ;;  %v1354_v20 = vsub.f32 %v1290_v2, %v1322_v42  ;;  %vm1641_vm6 = vmor %vm1639_vm5, %vm1640_vm4  ;;  %v1417_v42 = vsub.f32 %v2984_v34, %v3333_v48 }
 0x25c   : > { %1932 = vst [vmem:[%s3015_s23 + $0x78] sm:$0xff] %v1900_v16  ;;  %v1799_v41 = vmul.f32 %v1632_v37, %v1415_v46 }
 0x25d   : > { %v1636_v59 = vmul.f32 0.5, %v1635_v11  ;;  %v1386_v7 = vmax.f32 %v1354_v20, 0.0 }
 0x25e   : > { %v1113_v60 = vpop.xlane.xlu2 %1112  ;;  %v1834_v30 = vmul.f32 %v3357_v27, %v1799_v41 }
 0x25f   : > { %v1637_v12 = vsub.f32 1.5, %v1636_v59  ;;  %v3361_v45 = vmul.f32 %v2931_v47, %v1113_v60  ;;  %v1450_v43 = vadd.f32 1e-05, %v1386_v7 }
 0x260   : > { %v1248_v17 = vpop.xlane.xlu1 %1247  ;;  %v2294_v44 = vpop.eup %2293  ;;  %v1869_v61 = vadd.f32 %v3366_v55, %v1834_v30 }
 0x261   : > { %v1638_v13 = vmul.f32 %v2292_v33, %v1637_v12  ;;  %v1323_v56 = vmul.f32 %v3361_v45, %v3361_v45  ;;  %v1644_v36 = vmul.f32 %v2294_v44, %v1449_v0  ;;  %2295 = vrsqrt.f32 %v1450_v43 }
 0x262   : > { %v1901_v38 = vmax.f32 %v1869_v61, 0.0  ;;  %v1291_v39 = vmul.f32 %v1248_v17, %v2931_v47  ;;  %vm1650_vm7 = vweird.f32 %v2294_v44  ;;  %vm1659_vm11 = vweird.f32 %v1450_v43 }
 0x263   : > { %v1642_v1 = vsel %vm1641_vm6, %v2292_v33, %v1638_v13  ;;  %v1645_v35 = vmul.f32 %v2294_v44, %v1644_v36  ;;  %vm1651_vm9 = vmor %vm1649_vm8, %vm1650_vm7  ;;  %v1418_v12 = vsub.f32 %v3007_v3, %v3345_v57 }
 0x264   : > { %v1800_v24 = vmul.f32 %v1642_v1, %v1416_v25  ;;  %1933 = vst [vmem:[%s3015_s23 + $0x80] sm:$0xff] %v1901_v38  ;;  %v1355_v52 = vsub.f32 %v1291_v39, %v1323_v56 }
 0x265   : > { %v1646_v19 = vmul.f32 0.5, %v1645_v35 }
 0x266   : > { %v1835_v8 = vmul.f32 %v3357_v27, %v1800_v24  ;;  %v1115_v26 = vpop.xlane.xlu0 %1114  ;;  %v1387_v22 = vmax.f32 %v1355_v52, 0.0 }
 0x267   : > { %v3377_v58 = vmul.f32 %v2931_v47, %v1115_v26  ;;  %v2296_v6 = vpop.eup %2295  ;;  %v1647_v5 = vsub.f32 1.5, %v1646_v19 }
 0x268   : > { %v1870_v50 = vadd.f32 %v3366_v55, %v1835_v8  ;;  %v1654_v53 = vmul.f32 %v2296_v6, %v1450_v43  ;;  %v1451_v15 = vadd.f32 1e-05, %v1387_v22  ;;  %v1250_v23 = vpop.xlane.xlu2 %1249  ;;  %vm1660_vm10 = vweird.f32 %v2296_v6 }
 0x269   : > { %v1324_v33 = vmul.f32 %v3377_v58, %v3377_v58  ;;  %v1648_v51 = vmul.f32 %v2294_v44, %v1647_v5  ;;  %v1292_v62 = vmul.f32 %v1250_v23, %v2931_v47  ;;  %vm1661_vm12 = vmor %vm1659_vm11, %vm1660_vm10 }
 0x26a   : > { %v1902_v29 = vmax.f32 %v1870_v50, 0.0  ;;  %v1655_v16 = vmul.f32 %v2296_v6, %v1654_v53  ;;  %2297 = vrsqrt.f32 %v1451_v15  ;;  %vm1669_vm14 = vweird.f32 %v1451_v15 }
 0x26b   : > { %v1652_v54 = vsel %vm1651_vm9, %v2294_v44, %v1648_v51  ;;  %v1356_v2 = vsub.f32 %v1292_v62, %v1324_v33  ;;  %v1419_v53 = vsub.f32 %v3034_v49, %v3361_v45 }
 0x26c   : > { %1934 = vst [vmem:[%s3015_s23 + $0x88] sm:$0xff] %v1902_v29  ;;  %v1801_v46 = vmul.f32 %v1652_v54, %v1417_v42  ;;  %v1656_v11 = vmul.f32 0.5, %v1655_v16 }
 0x26d   : > { %v1388_v37 = vmax.f32 %v1356_v2, 0.0 }
 0x26e   : > { %v1117_v20 = vpop.xlane.xlu1 %1116  ;;  %v1836_v41 = vmul.f32 %v3357_v27, %v1801_v46  ;;  %v1657_v59 = vsub.f32 1.5, %v1656_v11 }
 0x26f   : > { %v3388_v0 = vmul.f32 %v2931_v47, %v1117_v20  ;;  %v1452_v7 = vadd.f32 1e-05, %v1388_v37 }
 0x270   : > { %v2298_v34 = vpop.eup %2297  ;;  %v1871_v48 = vadd.f32 %v3366_v55, %v1836_v41  ;;  %v1658_v60 = vmul.f32 %v2296_v6, %v1657_v59  ;;  %v1252_v44 = vpop.xlane.xlu0 %1251  ;;  %v1420_v41 = vsub.f32 %v3059_v21, %v3377_v58 }
 0x271   : > { %v1325_v30 = vmul.f32 %v3388_v0, %v3388_v0  ;;  %v1664_v17 = vmul.f32 %v2298_v34, %v1451_v15  ;;  %2299 = vrsqrt.f32 %v1452_v7  ;;  %v1293_v56 = vmul.f32 %v1252_v44, %v2931_v47 }
 0x272   : > { %v1903_v61 = vmax.f32 %v1871_v48, 0.0  ;;  %v1662_v13 = vsel %vm1661_vm12, %v2296_v6, %v1658_v60  ;;  %vm1670_vm13 = vweird.f32 %v2298_v34  ;;  %vm1679_vm1 = vweird.f32 %v1452_v7 }
 0x273   : > { %v1802_v25 = vmul.f32 %v1662_v13, %v1418_v12  ;;  %v1665_v36 = vmul.f32 %v2298_v34, %v1664_v17  ;;  %v1357_v38 = vsub.f32 %v1293_v56, %v1325_v30  ;;  %vm1671_vm15 = vmor %vm1669_vm14, %vm1670_vm13 }
 0x274   : > { %1935 = vst [vmem:[%s3015_s23 + $0x90] sm:$0xff] %v1903_v61 }
 0x275   : > { %v1837_v43 = vmul.f32 %v3357_v27, %v1802_v25  ;;  %v1666_v1 = vmul.f32 0.5, %v1665_v36  ;;  %v1389_v24 = vmax.f32 %v1357_v38, 0.0 }
 0x276   : > { %v1119_v39 = vpop.xlane.xlu2 %1118 }
 0x277   : > { %v3399_v35 = vmul.f32 %v2931_v47, %v1119_v39  ;;  %v2300_v3 = vpop.eup %2299  ;;  %v1872_v57 = vadd.f32 %v3366_v55, %v1837_v43  ;;  %v1667_v52 = vsub.f32 1.5, %v1666_v1  ;;  %v1453_v19 = vadd.f32 1e-05, %v1389_v24 }
 0x278   : > { %v1674_v8 = vmul.f32 %v2300_v3, %v1452_v7  ;;  %v1254_v22 = vpop.xlane.xlu1 %1253  ;;  %vm1680_vm0 = vweird.f32 %v2300_v3 }
 0x279   : > { %v1326_v26 = vmul.f32 %v3399_v35, %v3399_v35  ;;  %v1904_v6 = vmax.f32 %v1872_v57, 0.0  ;;  %v1668_v50 = vmul.f32 %v2298_v34, %v1667_v52  ;;  %v1294_v5 = vmul.f32 %v1254_v22, %v2931_v47  ;;  %vm1681_vm2 = vmor %vm1679_vm1, %vm1680_vm0 }
 0x27a   : > { %v1675_v33 = vmul.f32 %v2300_v3, %v1674_v8  ;;  %2301 = vrsqrt.f32 %v1453_v19  ;;  %vm1689_vm4 = vweird.f32 %v1453_v19 }
 0x27b   : > { %1936 = vst [vmem:[%s3015_s23 + $0x98] sm:$0xff] %v1904_v6  ;;  %v1672_v23 = vsel %vm1671_vm15, %v2298_v34, %v1668_v50  ;;  %v1358_v29 = vsub.f32 %v1294_v5, %v1326_v26 }
 0x27c   : > { %v1803_v51 = vmul.f32 %v1672_v23, %v1419_v53  ;;  %v1676_v62 = vmul.f32 0.5, %v1675_v33 }
 0x27d   : > { %v1390_v42 = vmax.f32 %v1358_v29, 0.0 }
 0x27e   : > { %v1121_v16 = vpop.xlane.xlu0 %1120  ;;  %v1838_v54 = vmul.f32 %v3357_v27, %v1803_v51  ;;  %v1677_v2 = vsub.f32 1.5, %v1676_v62 }
 0x27f   : > { %v3410_v15 = vmul.f32 %v2931_v47, %v1121_v16  ;;  %v1454_v46 = vadd.f32 1e-05, %v1390_v42  ;;  %v1422_v42 = vsub.f32 %v3110_v10, %v3399_v35 }
 0x280   : > { %v1256_v49 = vpop.xlane.xlu2 %1255  ;;  %v2302_v45 = vpop.eup %2301  ;;  %v1873_v11 = vadd.f32 %v3366_v55, %v1838_v54  ;;  %v1678_v37 = vmul.f32 %v2300_v3, %v1677_v2 }
 0x281   : > { %v1327_v20 = vmul.f32 %v3410_v15, %v3410_v15  ;;  %v1684_v59 = vmul.f32 %v2302_v45, %v1453_v19  ;;  %2303 = vrsqrt.f32 %v1454_v46  ;;  %v1295_v60 = vmul.f32 %v1256_v49, %v2931_v47 }
 0x282   : > { %v1905_v34 = vmax.f32 %v1873_v11, 0.0  ;;  %v1682_v48 = vsel %vm1681_vm2, %v2300_v3, %v1678_v37  ;;  %vm1690_vm3 = vweird.f32 %v2302_v45  ;;  %v1421_v3 = vsub.f32 %v3082_v14, %v3388_v0 }
 0x283   : > { %v1804_v30 = vmul.f32 %v1682_v48, %v1420_v41  ;;  %v1685_v12 = vmul.f32 %v2302_v45, %v1684_v59  ;;  %v1359_v17 = vsub.f32 %v1295_v60, %v1327_v20  ;;  %vm1691_vm5 = vmor %vm1689_vm4, %vm1690_vm3  ;;  %vm1699_vm7 = vweird.f32 %v1454_v46 }
 0x284   : > { %1937 = vst [vmem:[%s3015_s23 + $0xa0] sm:$0xff] %v1905_v34 }
 0x285   : > { %v1839_v44 = vmul.f32 %v3357_v27, %v1804_v30  ;;  %v1686_v7 = vmul.f32 0.5, %v1685_v12  ;;  %v1391_v13 = vmax.f32 %v1359_v17, 0.0 }
 0x286   : > { %v1123_v61 = vpop.xlane.xlu1 %1122 }
 0x287   : > { %v3421_v56 = vmul.f32 %v2931_v47, %v1123_v61  ;;  %v2304_v21 = vpop.eup %2303  ;;  %v1874_v58 = vadd.f32 %v3366_v55, %v1839_v44  ;;  %v1687_v25 = vsub.f32 1.5, %v1686_v7  ;;  %v1455_v38 = vadd.f32 1e-05, %v1391_v13 }
 0x288   : > { %v1694_v36 = vmul.f32 %v2304_v21, %v1454_v46  ;;  %v1258_v24 = vpop.xlane.xlu0 %1257  ;;  %vm1700_vm6 = vweird.f32 %v2304_v21  ;;  %v1423_v61 = vsub.f32 %v3132_v4, %v3410_v15 }
 0x289   : > { %v1328_v43 = vmul.f32 %v3421_v56, %v3421_v56  ;;  %v1906_v1 = vmax.f32 %v1874_v58, 0.0  ;;  %v1688_v39 = vmul.f32 %v2302_v45, %v1687_v25  ;;  %2305 = vrsqrt.f32 %v1455_v38  ;;  %vm1701_vm8 = vmor %vm1699_vm7, %vm1700_vm6 }
 0x28a   : > { %v1695_v57 = vmul.f32 %v2304_v21, %v1694_v36  ;;  %v1296_v52 = vmul.f32 %v1258_v24, %v2931_v47  ;;  %vm1709_vm10 = vweird.f32 %v1455_v38 }
 0x28b   : > { %1938 = vst [vmem:[%s3015_s23 + $0xa8] sm:$0xff] %v1906_v1  ;;  %v1692_v8 = vsel %vm1691_vm5, %v2302_v45, %v1688_v39 }
 0x28c   : > { %v1805_v26 = vmul.f32 %v1692_v8, %v1421_v3  ;;  %v1696_v22 = vmul.f32 0.5, %v1695_v57  ;;  %v1360_v6 = vsub.f32 %v1296_v52, %v1328_v43 }
 0x28e   : > { %v1125_v50 = vpop.xlane.xlu2 %1124  ;;  %v1840_v5 = vmul.f32 %v3357_v27, %v1805_v26  ;;  %v1697_v53 = vsub.f32 1.5, %v1696_v22  ;;  %v1392_v19 = vmax.f32 %v1360_v6, 0.0 }
 0x28f   : > { %v3432_v33 = vmul.f32 %v2931_v47, %v1125_v50  ;;  %v2306_v0 = vpop.eup %2305  ;;  %v1424_v50 = vsub.f32 %v3163_v63, %v3421_v56 }
 0x290   : > { %v1260_v14 = vpop.xlane.xlu1 %1259  ;;  %v1875_v23 = vadd.f32 %v3366_v55, %v1840_v5  ;;  %v1698_v29 = vmul.f32 %v2304_v21, %v1697_v53  ;;  %v1456_v51 = vadd.f32 1e-05, %v1392_v19  ;;  %v1704_v16 = vmul.f32 %v2306_v0, %v1455_v38 }
 0x291   : > { %v1329_v62 = vmul.f32 %v3432_v33, %v3432_v33  ;;  %v1297_v54 = vmul.f32 %v1260_v14, %v2931_v47  ;;  %vm1710_vm9 = vweird.f32 %v2306_v0 }
 0x292   : > { %v1907_v2 = vmax.f32 %v1875_v23, 0.0  ;;  %v1702_v49 = vsel %vm1701_vm8, %v2304_v21, %v1698_v29  ;;  %2307 = vrsqrt.f32 %v1456_v51  ;;  %v1705_v45 = vmul.f32 %v2306_v0, %v1704_v16  ;;  %vm1711_vm11 = vmor %vm1709_vm10, %vm1710_vm9 }
 0x293   : > { %v1806_v46 = vmul.f32 %v1702_v49, %v1422_v42  ;;  %v1361_v11 = vsub.f32 %v1297_v54, %v1329_v62  ;;  %vm1719_vm13 = vweird.f32 %v1456_v51 }
 0x294   : > { %1939 = vst [vmem:[%s3015_s23 + $0xb0] sm:$0xff] %v1907_v2  ;;  %v1706_v20 = vmul.f32 0.5, %v1705_v45 }
 0x295   : > { %v1841_v37 = vmul.f32 %v3357_v27, %v1806_v46  ;;  %v1393_v41 = vmax.f32 %v1361_v11, 0.0  ;;  %v1425_v46 = vsub.f32 %v3186_v31, %v3432_v33 }
 0x296   : > { %v1127_v59 = vpop.xlane.xlu0 %1126  ;;  %v1707_v35 = vsub.f32 1.5, %v1706_v20 }
 0x297   : > { %v3443_v34 = vmul.f32 %v2931_v47, %v1127_v59  ;;  %v1876_v10 = vadd.f32 %v3366_v55, %v1841_v37  ;;  %v1457_v48 = vadd.f32 1e-05, %v1393_v41 }
 0x298   : > { %v2308_v60 = vpop.eup %2307  ;;  %v1262_v12 = vpop.xlane.xlu2 %1261  ;;  %v1708_v44 = vmul.f32 %v2306_v0, %v1707_v35 }
 0x299   : > { %v1330_v30 = vmul.f32 %v3443_v34, %v3443_v34  ;;  %v1908_v17 = vmax.f32 %v1876_v10, 0.0  ;;  %v1714_v7 = vmul.f32 %v2308_v60, %v1456_v51  ;;  %2309 = vrsqrt.f32 %v1457_v48 }
 0x29a   : > { %v1298_v13 = vmul.f32 %v1262_v12, %v2931_v47  ;;  %v1712_v21 = vsel %vm1711_vm11, %v2306_v0, %v1708_v44  ;;  %vm1720_vm12 = vweird.f32 %v2308_v60  ;;  %vm1729_vm0 = vweird.f32 %v1457_v48 }
 0x29b   : > { %1940 = vst [vmem:[%s3015_s23 + $0xb8] sm:$0xff] %v1908_v17  ;;  %v1715_v58 = vmul.f32 %v2308_v60, %v1714_v7  ;;  %v1807_v25 = vmul.f32 %v1712_v21, %v1423_v61  ;;  %vm1721_vm14 = vmor %vm1719_vm13, %vm1720_vm12  ;;  %v1426_v44 = vsub.f32 %v3210_v32, %v3443_v34 }
 0x29c   : > { %v1362_v36 = vsub.f32 %v1298_v13, %v1330_v30 }
 0x29d   : > { %v1716_v43 = vmul.f32 0.5, %v1715_v58  ;;  %v1842_v1 = vmul.f32 %v3357_v27, %v1807_v25 }
 0x29e   : > { %v1394_v39 = vmax.f32 %v1362_v36, 0.0  ;;  %v1129_v24 = vpop.xlane.xlu1 %1128 }
 0x29f   : > { %v1717_v3 = vsub.f32 1.5, %v1716_v43  ;;  %v3454_v38 = vmul.f32 %v2931_v47, %v1129_v24  ;;  %v2310_v4 = vpop.eup %2309  ;;  %v1877_v15 = vadd.f32 %v3366_v55, %v1842_v1 }
 0x2a0   : > { %v1458_v57 = vadd.f32 1e-05, %v1394_v39  ;;  %v1264_v52 = vpop.xlane.xlu0 %1263  ;;  %v1724_v26 = vmul.f32 %v2310_v4, %v1457_v48  ;;  %vm1730_vm15 = vweird.f32 %v2310_v4 }
 0x2a1   : > { %v1718_v8 = vmul.f32 %v2308_v60, %v1717_v3  ;;  %v1331_v22 = vmul.f32 %v3454_v38, %v3454_v38  ;;  %v1909_v6 = vmax.f32 %v1877_v15, 0.0  ;;  %v1299_v19 = vmul.f32 %v1264_v52, %v2931_v47  ;;  %vm1731_vm1 = vmor %vm1729_vm0, %vm1730_vm15 }
 0x2a2   : > { %2311 = vrsqrt.f32 %v1458_v57  ;;  %v1725_v53 = vmul.f32 %v2310_v4, %v1724_v26  ;;  %vm1739_vm3 = vweird.f32 %v1458_v57  ;;  %v1427_v26 = vsub.f32 %v3238_v18, %v3454_v38 }
 0x2a3   : > { %v1722_v5 = vsel %vm1721_vm14, %v2308_v60, %v1718_v8  ;;  %1941 = vst [vmem:[%s3015_s23 + $0xc0] sm:$0xff] %v1909_v6  ;;  %v1363_v23 = vsub.f32 %v1299_v19, %v1331_v22 }
 0x2a4   : > { %v1808_v14 = vmul.f32 %v1722_v5, %v1424_v50  ;;  %v1726_v0 = vmul.f32 0.5, %v1725_v53 }
 0x2a5   : > { %v1395_v62 = vmax.f32 %v1363_v23, 0.0 }
 0x2a6   : > { %v1843_v29 = vmul.f32 %v3357_v27, %v1808_v14  ;;  %v1727_v51 = vsub.f32 1.5, %v1726_v0  ;;  %v1131_v63 = vpop.xlane.xlu2 %1130 }
 0x2a7   : > { %v1459_v2 = vadd.f32 1e-05, %v1395_v62  ;;  %v3488_v8 = vmul.f32 %v2931_v47, %v1131_v63 }
 0x2a8   : > { %v2312_v42 = vpop.eup %2311  ;;  %v1878_v16 = vadd.f32 %v3366_v55, %v1843_v29  ;;  %v1728_v56 = vmul.f32 %v2310_v4, %v1727_v51 }
 0x2a9   : > { %v1734_v54 = vmul.f32 %v2312_v42, %v1458_v57  ;;  %2313 = vrsqrt.f32 %v1459_v2  ;;  %vm1740_vm2 = vweird.f32 %v2312_v42  ;;  %vm1749_vm6 = vweird.f32 %v1459_v2 }
 0x2aa   : > { %v1910_v49 = vmax.f32 %v1878_v16, 0.0  ;;  %v1732_v45 = vsel %vm1731_vm1, %v2310_v4, %v1728_v56  ;;  %vm1741_vm4 = vmor %vm1739_vm3, %vm1740_vm2  ;;  %v1332_v19 = vmul.f32 %v3488_v8, %v3488_v8 }
 0x2ab   : > { %v1735_v11 = vmul.f32 %v2312_v42, %v1734_v54  ;;  %v1809_v37 = vmul.f32 %v1732_v45, %v1425_v46 }
 0x2ac   : > { %1942 = vst [vmem:[%s3015_s23 + $0xc8] sm:$0xff] %v1910_v49 }
 0x2ad   : > { %v1736_v20 = vmul.f32 0.5, %v1735_v11  ;;  %v1844_v59 = vmul.f32 %v3357_v27, %v1809_v37 }
 0x2ae   : > { %v1133_v41 = vpop.xlane.xlu0 %1132 }
 0x2af   : > { %v3470_v10 = vmul.f32 %v2931_v47, %v1133_v41  ;;  %v1737_v35 = vsub.f32 1.5, %v1736_v20  ;;  %v1879_v48 = vadd.f32 %v3366_v55, %v1844_v59  ;;  %v2314_v60 = vpop.eup %2313 }
 0x2b0   : > { %v1268_v33 = vpop.xlane.xlu2 %1267  ;;  %v1744_v7 = vmul.f32 %v2314_v60, %v1459_v2  ;;  %vm1750_vm5 = vweird.f32 %v2314_v60 }
 0x2b1   : > { %v1333_v31 = vmul.f32 %v3470_v10, %v3470_v10  ;;  %v1738_v30 = vmul.f32 %v2312_v42, %v1737_v35  ;;  %v1301_v12 = vmul.f32 %v1268_v33, %v2931_v47  ;;  %v1911_v17 = vmax.f32 %v1879_v48, 0.0  ;;  %vm1751_vm7 = vmor %vm1749_vm6, %vm1750_vm5 }
 0x2b2   : > { %v1745_v58 = vmul.f32 %v2314_v60, %v1744_v7  ;;  %v1429_v46 = vsub.f32 %v3278_v40, %v3470_v10 }
 0x2b3   : > { %v1742_v61 = vsel %vm1741_vm4, %v2312_v42, %v1738_v30  ;;  %v1365_v13 = vsub.f32 %v1301_v12, %v1333_v31  ;;  %1943 = vst [vmem:[%s3015_s23 + $0xd0] sm:$0xff] %v1911_v17 }
 0x2b4   : > { %v1810_v21 = vmul.f32 %v1742_v61, %v1426_v44  ;;  %v1746_v1 = vmul.f32 0.5, %v1745_v58 }
 0x2b5   : > { %v1397_v25 = vmax.f32 %v1365_v13, 0.0  ;;  %v1428_v13 = vsub.f32 %v3256_v9, %v3488_v8 }
 0x2b6   : > { %v1135_v36 = vpop.xlane.xlu1 %1134  ;;  %v1845_v43 = vmul.f32 %v3357_v27, %v1810_v21  ;;  %v1747_v32 = vsub.f32 1.5, %v1746_v1 }
 0x2b7   : > { %v3481_v39 = vmul.f32 %v2931_v47, %v1135_v36  ;;  %v1461_v24 = vadd.f32 1e-05, %v1397_v25 }
 0x2b8   : > { %v1880_v3 = vadd.f32 %v3366_v55, %v1845_v43  ;;  %v1270_v4 = vpop.xlane.xlu0 %1269  ;;  %v1748_v52 = vmul.f32 %v2314_v60, %v1747_v32 }
 0x2b9   : > { %v1334_v34 = vmul.f32 %v3481_v39, %v3481_v39  ;;  %2315 = vrsqrt.f32 %v1461_v24  ;;  %v1302_v15 = vmul.f32 %v1270_v4, %v2931_v47  ;;  %vm1769_vm9 = vweird.f32 %v1461_v24 }
 0x2ba   : > { %v1912_v57 = vmax.f32 %v1880_v3, 0.0  ;;  %v1752_v6 = vsel %vm1751_vm7, %v2314_v60, %v1748_v52  ;;  %v1430_v40 = vsub.f32 %v3301_v28, %v3481_v39 }
 0x2bb   : > { %v1366_v22 = vsub.f32 %v1302_v15, %v1334_v34  ;;  %v1811_v50 = vmul.f32 %v1752_v6, %v1427_v26 }
 0x2bc   : > { %1944 = vst [vmem:[%s3015_s23 + $0xd8] sm:$0xff] %v1912_v57 }
 0x2bd   : > { %v1398_v5 = vmax.f32 %v1366_v22, 0.0  ;;  %v1846_v23 = vmul.f32 %v3357_v27, %v1811_v50 }
 0x2be   : > { %v1266_v53 = vpop.xlane.xlu1 %1265 }
 0x2bf   : > { %v1300_v14 = vmul.f32 %v1266_v53, %v2931_v47  ;;  %v2316_v0 = vpop.eup %2315  ;;  %v1462_v29 = vadd.f32 1e-05, %v1398_v5  ;;  %v1881_v18 = vadd.f32 %v3366_v55, %v1846_v23 }
 0x2c0   : > { %v1764_v51 = vmul.f32 %v2316_v0, %v1461_v24  ;;  %vm1770_vm8 = vweird.f32 %v2316_v0 }
 0x2c1   : > { %v1364_v62 = vsub.f32 %v1300_v14, %v1332_v19  ;;  %2317 = vrsqrt.f32 %v1462_v29  ;;  %v1913_v16 = vmax.f32 %v1881_v18, 0.0  ;;  %vm1771_vm10 = vmor %vm1769_vm9, %vm1770_vm8  ;;  %vm1779_vm12 = vweird.f32 %v1462_v29 }
 0x2c2   : > { %v1765_v38 = vmul.f32 %v2316_v0, %v1764_v51 }
 0x2c3   : > { %v1396_v42 = vmax.f32 %v1364_v62, 0.0  ;;  %1945 = vst [vmem:[%s3015_s23 + $0xe0] sm:$0xff] %v1913_v16 }
 0x2c4   : > { %v1766_v63 = vmul.f32 0.5, %v1765_v38 }
 0x2c5   : > { %v1460_v56 = vadd.f32 1e-05, %v1396_v42 }
 0x2c6   : > { %v1767_v54 = vsub.f32 1.5, %v1766_v63 }
 0x2c7   : > { %2319 = vrsqrt.f32 %v1460_v56  ;;  %v2318_v2 = vpop.eup %2317  ;;  %vm1759_vm15 = vweird.f32 %v1460_v56 }
 0x2c8   : > { %v1768_v47 = vmul.f32 %v2316_v0, %v1767_v54  ;;  %v1774_v49 = vmul.f32 %v2318_v2, %v1462_v29  ;;  %vm1780_vm11 = vweird.f32 %v2318_v2 }
 0x2c9   : > { %vm1781_vm13 = vmor %vm1779_vm12, %vm1780_vm11 }
 0x2ca   : > { %v1772_v45 = vsel %vm1771_vm10, %v2316_v0, %v1768_v47  ;;  %v1775_v11 = vmul.f32 %v2318_v2, %v1774_v49 }
 0x2cb   : > { %v1813_v37 = vmul.f32 %v1772_v45, %v1429_v46 }
 0x2cc   : > { %v1776_v41 = vmul.f32 0.5, %v1775_v11 }
 0x2cd   : > { %v2320_v20 = vpop.eup %2319  ;;  %v1848_v59 = vmul.f32 %v3357_v27, %v1813_v37 }
 0x2ce   : > { %v1754_v35 = vmul.f32 %v2320_v20, %v1460_v56  ;;  %v1777_v48 = vsub.f32 1.5, %v1776_v41  ;;  %vm1760_vm14 = vweird.f32 %v2320_v20 }
 0x2cf   : > { %v1883_v31 = vadd.f32 %v3366_v55, %v1848_v59  ;;  %vm1761_vm0 = vmor %vm1759_vm15, %vm1760_vm14 }
 0x2d0   : > { %v1755_v33 = vmul.f32 %v2320_v20, %v1754_v35  ;;  %v1778_v60 = vmul.f32 %v2318_v2, %v1777_v48 }
 0x2d1   : > { %v1915_v30 = vmax.f32 %v1883_v31, 0.0 }
 0x2d2   : > { %v1756_v10 = vmul.f32 0.5, %v1755_v33  ;;  %v1782_v12 = vsel %vm1781_vm13, %v2318_v2, %v1778_v60 }
 0x2d3   : > { %1947 = vst [vmem:[%s3015_s23 + $0xf0] sm:$0xff] %v1915_v30  ;;  %v1814_v17 = vmul.f32 %v1782_v12, %v1430_v40 }
 0x2d4   : > { %v1757_v44 = vsub.f32 1.5, %v1756_v10 }
 0x2d5   : > { %v1849_v7 = vmul.f32 %v3357_v27, %v1814_v17 }
 0x2d6   : > { %v1758_v61 = vmul.f32 %v2320_v20, %v1757_v44 }
 0x2d7   : > { %v1884_v28 = vadd.f32 %v3366_v55, %v1849_v7 }
 0x2d8   : > { %v1762_v21 = vsel %vm1761_vm0, %v2320_v20, %v1758_v61 }
 0x2d9   : > { %v1812_v58 = vmul.f32 %v1762_v21, %v1428_v13  ;;  %v1916_v25 = vmax.f32 %v1884_v28, 0.0 }
 0x2db   : > { %v1847_v36 = vmul.f32 %v3357_v27, %v1812_v58  ;;  %1948 = vst [vmem:[%s3015_s23 + $0xf8] sm:$0xff] %v1916_v25 }
 0x2dd   : > { %v1882_v43 = vadd.f32 %v3366_v55, %v1847_v36  ;;  %1956 = sbr.rel (!%p2493_p5) target bundleno = 770 (0x302), region = 52 }
 0x2df   : > { %v1914_v1 = vmax.f32 %v1882_v43, 0.0 }
 0x2e1   : > { %1946 = vst [vmem:[%s3015_s23 + $0xe8] sm:$0xff] %v1914_v1 }
 0x2e2   : > { %s3595_s18 = smov (!%p1959_p11, %s1958_s18), 32 }
 0x2e3   : > { %s2171_s19 = sshll.u32 %s3595_s18, 3 }
 0x2e4   : > { %s1962_s20 = ssub.s32 256, %s2171_s19 }
 0x2e5   : > { %s1963_s22 = sshll.u32 %s1962_s20, 4 }
 0x2e6   : > { %1964 = vsyncadd %s3516_s16, %s1963_s22  ;;  %p3525_p12 = scmp.ne.s32.totalorder %s2171_s19, 0  ;;  %s2210_s11 = sshll.u32 %s2476_s28, 8 }
 0x2e7   : > { %s1967_s9 = scalar_lea.hbm %s3584_s7, %s2210_s11  ;;  %s1969_s8 = sshll.u32 %s3015_s23, 4  ;;  %s3534_s8 = int_to_ptr.vmem [resolvable:$true] %s1969_s8 }
 0x2e8   : > { %s1971_s13 = sshll.u32 %s1967_s9, 4  ;;  %s3585_s21 = sshll.u32 %s3595_s18, 7  ;;  %s3536_s13 = int_to_ptr.hbm [resolvable:$true] %s1971_s13 }
 0x2e9   : > { %s2336_s14 = sshra.s32 %s3534_s8, 4  ;;  %s2338_s19 = sshrl.u32 %s3585_s21, 4  ;;  %s2337_s14 = int_to_ptr.vmem [resolvable:$true] %s2336_s14 }
 0x2ea   : > { %s2343_s20 = scalar_lea.vmem %s2337_s14, %s2338_s19  ;;  %s2412_s28 = smov [#allocation2]  }
 0x2eb   : > { %p2344_p13 = scmp.ne.s32.totalorder %s2337_s14, %s2343_s20  ;;  %s2347_s22 = scalar_lea.vmem %s2412_s28, 512 }
 0x2ec   : > { %p2349_p2 = scmp.lt.s32.totalorder %s2347_s22, %s2343_s20 }
 0x2ed   : > { %p2345_p0 = pnand %p2344_p13, %p3525_p12 }
 0x2ef   : > { %p2346_p1 = pneg %p2345_p0 }
 0x2f1   : > { %p2351_p3 = pnand %p2349_p2, %p2346_p1 }
 0x2f3   : > { %2354 = shalt.err (!%p2351_p3)
}
 0x2f4   : > { %s2355_s23 = sshra.s32 %s3536_s13, 4  ;;  %s2366_s9 = scalar_lea.hbm %s3584_s7, 504  ;;  %s2356_s23 = int_to_ptr.hbm [resolvable:$true] %s2355_s23 }
 0x2f5   : > { %s2362_s11 = scalar_lea.hbm %s2356_s23, %s2338_s19  ;;  %p2367_p8 = scmp.lt.s32.totalorder %s2356_s23, %s3584_s7 }
 0x2f6   : > { %p2363_p4 = scmp.ne.s32.totalorder %s2356_s23, %s2362_s11  ;;  %p2368_p9 = scmp.lt.s32.totalorder %s2366_s9, %s2362_s11 }
 0x2f8   : > { %p2364_p5 = pnand %p2363_p4, %p3525_p12  ;;  %p2369_p10 = por %p2368_p9, %p2367_p8 }
 0x2fa   : > { %p2365_p7 = pneg %p2364_p5 }
 0x2fc   : > { %p2370_p11 = pnand %p2369_p10, %p2365_p7 }
 0x2fe   : > { %2373 = shalt.err (!%p2370_p11)
}
 0x2ff   : > { %s2413_s20 = smov 128   ;;  %s2414_s19 = smov 8  }
 0x300   : > { %s3589_s28 = sshll.u32 %s3595_s18, 7 }
 0x301   : > { %1977 = dma.vmem_to_hbm [thread:$0]  (%p3525_p12), %s3534_s8, %s3589_s28, %s3536_s13, %s3516_s16, %s2413_s20, %s2413_s20, %s2414_s19  }
 0x302 PF: > { %p2216_p13 = scmp.ge.s32.totalorder %s2409_s27, 2  ;;  %s1986_s21 = sand.u32 1, %s2397_s24  }
 0x303   : > { %s1987_s22 = scalar_lea.sflag [#allocation3], %s1986_s21 }
 0x304   : > { %p2213_p0 = pnand %p2216_p13, %p2497_p6 }
 0x306   : > { %p2214_p1 = pneg %p2213_p0 }
 0x308   : > { %2392 = dma.done.wait (%p2214_p1), %s1987_s22, 4096  }
 0x309   : > { %2394 = vsyncadd (%p2214_p1), %s1987_s22, 4294963200  ;;  %p17_p2 = scmp.ge.s32.totalorder %s2480_s30, 4   ;;  %s3590_s24 = smov %s2401_s25 }
 0x30a   : > { %s3591_s25 = smov %s2405_s26  ;;  %s3592_s26 = smov %s2491_s10 }
 0x30b   : > { %s3593_s27 = smov %s2480_s30  ;;  %19 = sbr.rel (!%p17_p2) target bundleno = 3 (0x3), region = 83 }
 0x310   :  { %1993 = vsyncpa [#allocation3], 1 }
 0x311   :  { %1995 = vsyncpa [#allocation3 + $0x1], 1 }

</bundles_post_ra>
